<compile_context>
chip_gen: v7x
topology: tpu7x:2x2x1
jax: 0.10.0
libtpu: 0.0.40
codegen_flags: <defaults>
</compile_context>

<pallas_src>
import jax
import jax.numpy as jnp
from jax.experimental import pallas as pl
from jax.experimental.pallas import tpu as pltpu

# --- small synthetic BERT config (IndoBERT is bert-base; shrunk for a demo) ---
VOCAB = 128
HIDDEN = 128          # lane-dense (= vreg lane width)
N_LAYERS = 2
N_HEADS = 4
HEAD_DIM = HIDDEN // N_HEADS
INTERMEDIATE = 512
MAX_POS = 16
LN_EPS = 1e-12
BATCH = 2
SEQ = 8


# ----------------------------- fused Pallas kernel ---------------------------
def _bert_encoder_kernel(
    ids_ref, mask_ref,
    word_emb_ref, pos_type_ref,
    emb_g_ref, emb_b_ref,
    wqkv_ref, bqkv_ref, wo_ref, bo_ref,
    ln1_g_ref, ln1_b_ref,
    wi_ref, bi_ref, wo2_ref, bo2_ref,
    ln2_g_ref, ln2_b_ref,
    out_ref,
):
    s = ids_ref.shape[1]
    vocab, h = word_emb_ref.shape
    d_head = h // N_HEADS

    def layernorm(x, g, b):
        mean = jnp.mean(x, axis=-1, keepdims=True)
        var = jnp.mean(jnp.square(x - mean), axis=-1, keepdims=True)
        inv = jax.lax.rsqrt(var + LN_EPS)
        return (x - mean) * inv * g + b

    def dense(x, w_bf16, bias_f32):
        # bf16 MXU matmul with f32 accumulation; elementwise math stays f32.
        return jnp.dot(x.astype(jnp.bfloat16), w_bf16,
                       preferred_element_type=jnp.float32) + bias_f32

    # ---- fused embedding lookup: one-hot (S,VOCAB) @ word_emb (VOCAB,H) ----
    ids = ids_ref[0]                                          # (S, 1) int32
    vocab_iota = jax.lax.broadcasted_iota(jnp.int32, (s, vocab), 1)
    onehot = jnp.where(vocab_iota == ids, 1.0, 0.0)           # (S, VOCAB) f32
    emb = jnp.dot(onehot, word_emb_ref[...],
                  preferred_element_type=jnp.float32)         # (S, H) f32
    emb = emb + pos_type_ref[...]                             # + pos + type emb

    hid = layernorm(emb, emb_g_ref[...], emb_b_ref[...])      # (S, H) f32

    # ---- additive attention mask, built in-kernel, hoisted out of all loops
    mask_add = (1.0 - mask_ref[0].astype(jnp.float32)) * -10000.0   # (1, S)
    mask_b = mask_add[None, :, :]                                   # (1, 1, S)

    def split_heads(x2d):   # (S, H) bf16 -> (N_HEADS, S, d_head) bf16
        return jnp.stack(
            [x2d[:, i * d_head:(i + 1) * d_head] for i in range(N_HEADS)],
            axis=0)

    for l in range(N_LAYERS):                                 # static unroll
        # ---- self-attention: fused QKV projection (one MXU pass) ----
        qkv = dense(hid, wqkv_ref[l], bqkv_ref[l]).astype(jnp.bfloat16)  # (S,3H)
        # 1/sqrt(head_dim) already folded into the Q weights.
        q = split_heads(qkv[:, 0 * h:1 * h])                  # (NH, S, DH) bf16
        k = split_heads(qkv[:, 1 * h:2 * h])
        v = split_heads(qkv[:, 2 * h:3 * h])

        # One batched MXU matmul over all heads (bf16 in, f32 accumulate).
        scores = jnp.einsum("hqd,hkd->hqk", q, k,
                            preferred_element_type=jnp.float32) + mask_b
        m = jnp.max(scores, axis=-1, keepdims=True)
        p = jnp.exp(scores - m)
        p = p * pl.reciprocal(jnp.sum(p, axis=-1, keepdims=True),
                              approx=True)                    # EUP, not VALU div
        ctx = jnp.einsum("hqk,hkd->hqd", p.astype(jnp.bfloat16), v,
                         preferred_element_type=jnp.float32)  # (NH, S, DH) f32
        ctx = jnp.concatenate([ctx[i] for i in range(N_HEADS)], axis=-1)  # (S,H)

        attn_out = dense(ctx, wo_ref[l], bo_ref[l])
        hid = layernorm(attn_out + hid, ln1_g_ref[l], ln1_b_ref[l])

        # ---- feed-forward ----
        inter = dense(hid, wi_ref[l], bi_ref[l])
        # TODO(synk): HF BERT uses exact erf GELU; tanh approximation used here.
        inter = 0.5 * inter * (1.0 + jnp.tanh(
            0.7978845608028654 * (inter + 0.044715 * inter * inter * inter)))
        ffn = dense(inter, wo2_ref[l], bo2_ref[l])
        hid = layernorm(ffn + hid, ln2_g_ref[l], ln2_b_ref[l])

    # ---- fused mean pool over sequence (matches torch .mean(dim=1)) ----
    # TODO(synk): padded positions are included, exactly like the reference.
    pooled = jnp.mean(hid, axis=0, keepdims=True)             # (1, H)
    # TODO(synk): nn.Dropout(0.1) on pooled output is identity in eval mode.
    out_ref[...] = pooled.reshape(1, 1, h).astype(out_ref.dtype)


# ----------------------------- parameters ------------------------------------
def init_params(key):
    def dense(k, fan_in, fan_out):
        return jax.random.normal(k, (fan_in, fan_out), jnp.float32) * 0.02

    keys = jax.random.split(key, 3 + N_LAYERS)
    word_emb = jax.random.normal(keys[0], (VOCAB, HIDDEN), jnp.float32) * 0.02
    pos_emb = jax.random.normal(keys[1], (MAX_POS, HIDDEN), jnp.float32) * 0.02
    type_emb = jax.random.normal(keys[2], (2, HIDDEN), jnp.float32) * 0.02

    params = {
        "word_emb": word_emb,
        # pos + (all-zero) token_type embedding pre-combined once at init.
        "pos_type_emb": pos_emb + type_emb[0][None, :],
        "emb_ln_g": jnp.ones((1, HIDDEN), jnp.float32),
        "emb_ln_b": jnp.zeros((1, HIDDEN), jnp.float32),
    }

    scale = 1.0 / (HEAD_DIM ** 0.5)   # folded into Q projection once, here
    wqkv, bqkv, wo, bo, wi, bi, wo2, bo2 = ([] for _ in range(8))
    for l in range(N_LAYERS):
        lk = jax.random.split(keys[3 + l], 6)
        wq = dense(lk[0], HIDDEN, HIDDEN) * scale
        wk = dense(lk[1], HIDDEN, HIDDEN)
        wv = dense(lk[2], HIDDEN, HIDDEN)
        wqkv.append(jnp.concatenate([wq, wk, wv], axis=1))        # (H, 3H)
        bqkv.append(jnp.zeros((1, 3 * HIDDEN), jnp.float32))
        wo.append(dense(lk[3], HIDDEN, HIDDEN))
        bo.append(jnp.zeros((1, HIDDEN), jnp.float32))
        wi.append(dense(lk[4], HIDDEN, INTERMEDIATE))
        bi.append(jnp.zeros((1, INTERMEDIATE), jnp.float32))
        wo2.append(dense(lk[5], INTERMEDIATE, HIDDEN))
        bo2.append(jnp.zeros((1, HIDDEN), jnp.float32))

    # Matmul weights bf16 (MXU operands); biases / LN params f32.
    params.update({
        "wqkv": jnp.stack(wqkv).astype(jnp.bfloat16),
        "bqkv": jnp.stack(bqkv),
        "wo": jnp.stack(wo).astype(jnp.bfloat16),
        "bo": jnp.stack(bo),
        "wi": jnp.stack(wi).astype(jnp.bfloat16),
        "bi": jnp.stack(bi),
        "wo2": jnp.stack(wo2).astype(jnp.bfloat16),
        "bo2": jnp.stack(bo2),
        "ln1_g": jnp.ones((N_LAYERS, 1, HIDDEN), jnp.float32),
        "ln1_b": jnp.zeros((N_LAYERS, 1, HIDDEN), jnp.float32),
        "ln2_g": jnp.ones((N_LAYERS, 1, HIDDEN), jnp.float32),
        "ln2_b": jnp.zeros((N_LAYERS, 1, HIDDEN), jnp.float32),
    })
    return params


def _cost_estimate(b, s, args):
    flops_embed = 2 * s * VOCAB * HIDDEN
    flops_layer = (2 * s * HIDDEN * 3 * HIDDEN                # fused QKV
                   + 2 * N_HEADS * s * s * HEAD_DIM * 2       # scores + context
                   + 2 * s * HIDDEN * HIDDEN                  # attn out proj
                   + 2 * s * HIDDEN * INTERMEDIATE            # FFN in
                   + 2 * s * INTERMEDIATE * HIDDEN)           # FFN out
    flops = b * (flops_embed + N_LAYERS * flops_layer)
    transcendentals = b * N_LAYERS * (N_HEADS * s * s + s * INTERMEDIATE + 5 * s)
    bytes_accessed = sum(int(x.size) * x.dtype.itemsize for x in args)
    bytes_accessed += b * HIDDEN * 4
    return pl.CostEstimate(flops=int(flops),
                           transcendentals=int(transcendentals),
                           bytes_accessed=int(bytes_accessed))


# ----------------------------- forward pass -----------------------------------
def bert_multitask_forward(params, input_ids, attention_mask):
    b, s = input_ids.shape
    h = HIDDEN

    # int32 ids/mask go straight into the kernel (gather + mask built in-kernel).
    ids3 = input_ids.astype(jnp.int32).reshape(b, s, 1)       # (B, S, 1)
    mask3 = attention_mask.astype(jnp.int32).reshape(b, 1, s)  # (B, 1, S)
    pos_type = params["pos_type_emb"][:s]                      # (S, H)

    weight_args = (
        params["word_emb"], pos_type,
        params["emb_ln_g"], params["emb_ln_b"],
        params["wqkv"], params["bqkv"], params["wo"], params["bo"],
        params["ln1_g"], params["ln1_b"],
        params["wi"], params["bi"], params["wo2"], params["bo2"],
        params["ln2_g"], params["ln2_b"],
    )

    in_specs = [
        pl.BlockSpec((1, s, 1), lambda bb: (bb, 0, 0)),        # input_ids
        pl.BlockSpec((1, 1, s), lambda bb: (bb, 0, 0)),        # attention_mask
    ] + [
        # Weights: full-shape blocks, constant index_map -> fetched once,
        # shared across the (parallel) batch grid.
        pl.BlockSpec(w.shape, lambda bb, n=w.ndim: (0,) * n)
        for w in weight_args
    ]
    out_spec = pl.BlockSpec((1, 1, h), lambda bb: (bb, 0, 0))

    out = pl.pallas_call(
        _bert_encoder_kernel,
        out_shape=jax.ShapeDtypeStruct((b, 1, h), jnp.float32),
        grid=(b,),
        in_specs=in_specs,
        out_specs=out_spec,
        compiler_params=pltpu.CompilerParams(
            dimension_semantics=("parallel",),          # megacore on v7x
            vmem_limit_bytes=32 * 1024 * 1024),
        cost_estimate=_cost_estimate(b, s, (ids3, mask3) + weight_args),
    )(ids3, mask3, *weight_args)

    return out[:, 0, :]                                        # (B, H)


# ----------------------------- main -------------------------------------------
if __name__ == "__main__":
    key = jax.random.PRNGKey(0)
    pkey, ikey = jax.random.split(key)
    params = init_params(pkey)

    input_ids = jax.random.randint(ikey, (BATCH, SEQ), 0, VOCAB, dtype=jnp.int32)
    attention_mask = jnp.array(
        [[1, 1, 1, 1, 1, 1, 1, 1],
         [1, 1, 1, 1, 1, 1, 0, 0]], dtype=jnp.int32)

    fwd = jax.jit(lambda ids, am: bert_multitask_forward(params, ids, am))
    pooled = fwd(input_ids, attention_mask)
    jax.block_until_ready(pooled)

    assert pooled.shape == (BATCH, HIDDEN)
    assert bool(jnp.all(jnp.isfinite(pooled)))
    print("KERNEL_OK")
</pallas_src>

<mosaic_0001>
module attributes {stable_mosaic.version = 11 : i64} {
  func.func @_bert_encoder_kernel(%arg0: i32, %arg1: memref<1x8x1xi32, #tpu.memory_space<vmem>>, %arg2: memref<1x1x8xi32, #tpu.memory_space<vmem>>, %arg3: memref<128x128xf32, #tpu.memory_space<vmem>>, %arg4: memref<8x128xf32, #tpu.memory_space<vmem>>, %arg5: memref<1x128xf32, #tpu.memory_space<vmem>>, %arg6: memref<1x128xf32, #tpu.memory_space<vmem>>, %arg7: memref<2x128x384xbf16, #tpu.memory_space<vmem>>, %arg8: memref<2x1x384xf32, #tpu.memory_space<vmem>>, %arg9: memref<2x128x128xbf16, #tpu.memory_space<vmem>>, %arg10: memref<2x1x128xf32, #tpu.memory_space<vmem>>, %arg11: memref<2x1x128xf32, #tpu.memory_space<vmem>>, %arg12: memref<2x1x128xf32, #tpu.memory_space<vmem>>, %arg13: memref<2x128x512xbf16, #tpu.memory_space<vmem>>, %arg14: memref<2x1x512xf32, #tpu.memory_space<vmem>>, %arg15: memref<2x512x128xbf16, #tpu.memory_space<vmem>>, %arg16: memref<2x1x128xf32, #tpu.memory_space<vmem>>, %arg17: memref<2x1x128xf32, #tpu.memory_space<vmem>>, %arg18: memref<2x1x128xf32, #tpu.memory_space<vmem>>, %arg19: memref<1x1x128xf32, #tpu.memory_space<vmem>>) attributes {dimension_semantics = [#tpu.dimension_semantics<parallel>], iteration_bounds = array<i64: 2>, scalar_prefetch = 0 : i64, scratch_operands = 0 : i64, tpu.core_type = #tpu.core_type<tc>, window_params = [{transform_indices = @transform_0, window_bounds = array<i64: 1, 8, 1>}, {transform_indices = @transform_1, window_bounds = array<i64: 1, 1, 8>}, {pipeline_mode = #tpu.pipeline_mode<synchronous>, transform_indices = @transform_2, window_bounds = array<i64: 128, 128>}, {pipeline_mode = #tpu.pipeline_mode<synchronous>, transform_indices = @transform_3, window_bounds = array<i64: 8, 128>}, {pipeline_mode = #tpu.pipeline_mode<synchronous>, transform_indices = @transform_4, window_bounds = array<i64: 1, 128>}, {pipeline_mode = #tpu.pipeline_mode<synchronous>, transform_indices = @transform_5, window_bounds = array<i64: 1, 128>}, {pipeline_mode = #tpu.pipeline_mode<synchronous>, transform_indices = @transform_6, window_bounds = array<i64: 2, 128, 384>}, {pipeline_mode = #tpu.pipeline_mode<synchronous>, transform_indices = @transform_7, window_bounds = array<i64: 2, 1, 384>}, {pipeline_mode = #tpu.pipeline_mode<synchronous>, transform_indices = @transform_8, window_bounds = array<i64: 2, 128, 128>}, {pipeline_mode = #tpu.pipeline_mode<synchronous>, transform_indices = @transform_9, window_bounds = array<i64: 2, 1, 128>}, {pipeline_mode = #tpu.pipeline_mode<synchronous>, transform_indices = @transform_10, window_bounds = array<i64: 2, 1, 128>}, {pipeline_mode = #tpu.pipeline_mode<synchronous>, transform_indices = @transform_11, window_bounds = array<i64: 2, 1, 128>}, {pipeline_mode = #tpu.pipeline_mode<synchronous>, transform_indices = @transform_12, window_bounds = array<i64: 2, 128, 512>}, {pipeline_mode = #tpu.pipeline_mode<synchronous>, transform_indices = @transform_13, window_bounds = array<i64: 2, 1, 512>}, {pipeline_mode = #tpu.pipeline_mode<synchronous>, transform_indices = @transform_14, window_bounds = array<i64: 2, 512, 128>}, {pipeline_mode = #tpu.pipeline_mode<synchronous>, transform_indices = @transform_15, window_bounds = array<i64: 2, 1, 128>}, {pipeline_mode = #tpu.pipeline_mode<synchronous>, transform_indices = @transform_16, window_bounds = array<i64: 2, 1, 128>}, {pipeline_mode = #tpu.pipeline_mode<synchronous>, transform_indices = @transform_17, window_bounds = array<i64: 2, 1, 128>}, {transform_indices = @transform_18, window_bounds = array<i64: 1, 1, 128>}]} {
    %c0 = arith.constant 0 : index
    %c0_0 = arith.constant 0 : index
    %c0_1 = arith.constant 0 : index
    %0 = vector.load %arg1[%c0, %c0_0, %c0_1] : memref<1x8x1xi32, #tpu.memory_space<vmem>>, vector<1x8x1xi32>
    %1 = vector.shape_cast %0 : vector<1x8x1xi32> to vector<8x1xi32>
    %2 = tpu.iota {dimensions = array<i32: 1>} : vector<8x128xi32>
    %3 = vector.broadcast %1 : vector<8x1xi32> to vector<8x128xi32>
    %4 = arith.cmpi eq, %2, %3 : vector<8x128xi32>
    %cst = arith.constant 1.000000e+00 : f32
    %cst_2 = arith.constant 0.000000e+00 : f32
    %5 = vector.broadcast %cst : f32 to vector<8x128xf32>
    %6 = vector.broadcast %cst_2 : f32 to vector<8x128xf32>
    %7 = arith.select %4, %5, %6 : vector<8x128xi1>, vector<8x128xf32>
    %c0_3 = arith.constant 0 : index
    %c0_4 = arith.constant 0 : index
    %8 = vector.load %arg3[%c0_3, %c0_4] : memref<128x128xf32, #tpu.memory_space<vmem>>, vector<128x128xf32>
    %cst_5 = arith.constant dense<0.000000e+00> : vector<8x128xf32>
    %9 = tpu.matmul %7, %8, %cst_5 {dimension_numbers = #tpu.dot_dimension_numbers<[1], [0], [0], [1], [0, 0, 1, 1], [], []>} : vector<8x128xf32>, vector<128x128xf32>, vector<8x128xf32> -> vector<8x128xf32>
    %c0_6 = arith.constant 0 : index
    %c0_7 = arith.constant 0 : index
    %10 = vector.load %arg4[%c0_6, %c0_7] : memref<8x128xf32, #tpu.memory_space<vmem>>, vector<8x128xf32>
    %11 = arith.addf %9, %10 : vector<8x128xf32>
    %c0_8 = arith.constant 0 : index
    %c0_9 = arith.constant 0 : index
    %12 = vector.load %arg5[%c0_8, %c0_9] : memref<1x128xf32, #tpu.memory_space<vmem>>, vector<1x128xf32>
    %c0_10 = arith.constant 0 : index
    %c0_11 = arith.constant 0 : index
    %13 = vector.load %arg6[%c0_10, %c0_11] : memref<1x128xf32, #tpu.memory_space<vmem>>, vector<1x128xf32>
    %cst_12 = arith.constant dense<0.000000e+00> : vector<8xf32>
    %14 = vector.multi_reduction <add>, %11, %cst_12 [1] : vector<8x128xf32> to vector<8xf32>
    %15 = vector.shape_cast %14 : vector<8xf32> to vector<8x1xf32>
    %cst_13 = arith.constant 1.280000e+02 : f32
    %16 = vector.broadcast %cst_13 : f32 to vector<8x1xf32>
    %17 = arith.divf %15, %16 : vector<8x1xf32>
    %18 = vector.broadcast %17 : vector<8x1xf32> to vector<8x128xf32>
    %19 = arith.subf %11, %18 : vector<8x128xf32>
    %20 = arith.mulf %19, %19 : vector<8x128xf32>
    %cst_14 = arith.constant dense<0.000000e+00> : vector<8xf32>
    %21 = vector.multi_reduction <add>, %20, %cst_14 [1] : vector<8x128xf32> to vector<8xf32>
    %22 = vector.shape_cast %21 : vector<8xf32> to vector<8x1xf32>
    %cst_15 = arith.constant 1.280000e+02 : f32
    %23 = vector.broadcast %cst_15 : f32 to vector<8x1xf32>
    %24 = arith.divf %22, %23 : vector<8x1xf32>
    %cst_16 = arith.constant 9.99999996E-13 : f32
    %25 = vector.broadcast %cst_16 : f32 to vector<8x1xf32>
    %26 = arith.addf %24, %25 : vector<8x1xf32>
    %27 = math.rsqrt %26 : vector<8x1xf32>
    %28 = vector.broadcast %17 : vector<8x1xf32> to vector<8x128xf32>
    %29 = arith.subf %11, %28 : vector<8x128xf32>
    %30 = vector.broadcast %27 : vector<8x1xf32> to vector<8x128xf32>
    %31 = arith.mulf %29, %30 : vector<8x128xf32>
    %32 = vector.broadcast %12 : vector<1x128xf32> to vector<8x128xf32>
    %33 = arith.mulf %31, %32 : vector<8x128xf32>
    %34 = vector.broadcast %13 : vector<1x128xf32> to vector<8x128xf32>
    %35 = arith.addf %33, %34 : vector<8x128xf32>
    %c0_17 = arith.constant 0 : index
    %c0_18 = arith.constant 0 : index
    %c0_19 = arith.constant 0 : index
    %36 = vector.load %arg2[%c0_17, %c0_18, %c0_19] : memref<1x1x8xi32, #tpu.memory_space<vmem>>, vector<1x1x8xi32>
    %37 = vector.shape_cast %36 : vector<1x1x8xi32> to vector<1x8xi32>
    %38 = arith.sitofp %37 : vector<1x8xi32> to vector<1x8xf32>
    %cst_20 = arith.constant 1.000000e+00 : f32
    %39 = vector.broadcast %cst_20 : f32 to vector<1x8xf32>
    %40 = arith.subf %39, %38 : vector<1x8xf32>
    %cst_21 = arith.constant -1.000000e+04 : f32
    %41 = vector.broadcast %cst_21 : f32 to vector<1x8xf32>
    %42 = arith.mulf %40, %41 : vector<1x8xf32>
    %43 = vector.shape_cast %42 : vector<1x8xf32> to vector<1x1x8xf32>
    %c0_22 = arith.constant 0 : index
    %c0_23 = arith.constant 0 : index
    %c0_24 = arith.constant 0 : index
    %44 = vector.load %arg7[%c0_22, %c0_23, %c0_24] : memref<2x128x384xbf16, #tpu.memory_space<vmem>>, vector<1x128x384xbf16>
    %45 = vector.shape_cast %44 : vector<1x128x384xbf16> to vector<128x384xbf16>
    %c0_25 = arith.constant 0 : index
    %c0_26 = arith.constant 0 : index
    %c0_27 = arith.constant 0 : index
    %46 = vector.load %arg8[%c0_25, %c0_26, %c0_27] : memref<2x1x384xf32, #tpu.memory_space<vmem>>, vector<1x1x384xf32>
    %47 = vector.shape_cast %46 : vector<1x1x384xf32> to vector<1x384xf32>
    %48 = arith.truncf %35 : vector<8x128xf32> to vector<8x128xbf16>
    %cst_28 = arith.constant dense<0.000000e+00> : vector<8x384xf32>
    %49 = tpu.matmul %48, %45, %cst_28 {dimension_numbers = #tpu.dot_dimension_numbers<[1], [0], [0], [1], [0, 0, 1, 1], [], []>} : vector<8x128xbf16>, vector<128x384xbf16>, vector<8x384xf32> -> vector<8x384xf32>
    %50 = vector.broadcast %47 : vector<1x384xf32> to vector<8x384xf32>
    %51 = arith.addf %49, %50 : vector<8x384xf32>
    %52 = arith.truncf %51 : vector<8x384xf32> to vector<8x384xbf16>
    %53 = vector.extract_strided_slice %52 {offsets = [0, 0], sizes = [8, 128], strides = [1, 1]} : vector<8x384xbf16> to vector<8x128xbf16>
    %54 = vector.extract_strided_slice %53 {offsets = [0, 0], sizes = [8, 32], strides = [1, 1]} : vector<8x128xbf16> to vector<8x32xbf16>
    %55 = vector.extract_strided_slice %53 {offsets = [0, 32], sizes = [8, 32], strides = [1, 1]} : vector<8x128xbf16> to vector<8x32xbf16>
    %56 = vector.extract_strided_slice %53 {offsets = [0, 64], sizes = [8, 32], strides = [1, 1]} : vector<8x128xbf16> to vector<8x32xbf16>
    %57 = vector.extract_strided_slice %53 {offsets = [0, 96], sizes = [8, 32], strides = [1, 1]} : vector<8x128xbf16> to vector<8x32xbf16>
    %58 = vector.shape_cast %54 : vector<8x32xbf16> to vector<1x8x32xbf16>
    %59 = vector.shape_cast %55 : vector<8x32xbf16> to vector<1x8x32xbf16>
    %60 = vector.shape_cast %56 : vector<8x32xbf16> to vector<1x8x32xbf16>
    %61 = vector.shape_cast %57 : vector<8x32xbf16> to vector<1x8x32xbf16>
    %62 = tpu.concatenate %58, %59, %60, %61 in 0 : vector<1x8x32xbf16>, vector<1x8x32xbf16>, vector<1x8x32xbf16>, vector<1x8x32xbf16> -> vector<4x8x32xbf16>
    %63 = vector.extract_strided_slice %52 {offsets = [0, 128], sizes = [8, 128], strides = [1, 1]} : vector<8x384xbf16> to vector<8x128xbf16>
    %64 = vector.extract_strided_slice %63 {offsets = [0, 0], sizes = [8, 32], strides = [1, 1]} : vector<8x128xbf16> to vector<8x32xbf16>
    %65 = vector.extract_strided_slice %63 {offsets = [0, 32], sizes = [8, 32], strides = [1, 1]} : vector<8x128xbf16> to vector<8x32xbf16>
    %66 = vector.extract_strided_slice %63 {offsets = [0, 64], sizes = [8, 32], strides = [1, 1]} : vector<8x128xbf16> to vector<8x32xbf16>
    %67 = vector.extract_strided_slice %63 {offsets = [0, 96], sizes = [8, 32], strides = [1, 1]} : vector<8x128xbf16> to vector<8x32xbf16>
    %68 = vector.shape_cast %64 : vector<8x32xbf16> to vector<1x8x32xbf16>
    %69 = vector.shape_cast %65 : vector<8x32xbf16> to vector<1x8x32xbf16>
    %70 = vector.shape_cast %66 : vector<8x32xbf16> to vector<1x8x32xbf16>
    %71 = vector.shape_cast %67 : vector<8x32xbf16> to vector<1x8x32xbf16>
    %72 = tpu.concatenate %68, %69, %70, %71 in 0 : vector<1x8x32xbf16>, vector<1x8x32xbf16>, vector<1x8x32xbf16>, vector<1x8x32xbf16> -> vector<4x8x32xbf16>
    %73 = vector.extract_strided_slice %52 {offsets = [0, 256], sizes = [8, 128], strides = [1, 1]} : vector<8x384xbf16> to vector<8x128xbf16>
    %74 = vector.extract_strided_slice %73 {offsets = [0, 0], sizes = [8, 32], strides = [1, 1]} : vector<8x128xbf16> to vector<8x32xbf16>
    %75 = vector.extract_strided_slice %73 {offsets = [0, 32], sizes = [8, 32], strides = [1, 1]} : vector<8x128xbf16> to vector<8x32xbf16>
    %76 = vector.extract_strided_slice %73 {offsets = [0, 64], sizes = [8, 32], strides = [1, 1]} : vector<8x128xbf16> to vector<8x32xbf16>
    %77 = vector.extract_strided_slice %73 {offsets = [0, 96], sizes = [8, 32], strides = [1, 1]} : vector<8x128xbf16> to vector<8x32xbf16>
    %78 = vector.shape_cast %74 : vector<8x32xbf16> to vector<1x8x32xbf16>
    %79 = vector.shape_cast %75 : vector<8x32xbf16> to vector<1x8x32xbf16>
    %80 = vector.shape_cast %76 : vector<8x32xbf16> to vector<1x8x32xbf16>
    %81 = vector.shape_cast %77 : vector<8x32xbf16> to vector<1x8x32xbf16>
    %82 = tpu.concatenate %78, %79, %80, %81 in 0 : vector<1x8x32xbf16>, vector<1x8x32xbf16>, vector<1x8x32xbf16>, vector<1x8x32xbf16> -> vector<4x8x32xbf16>
    "tpu.trace_start"() <{level = 10 : i32, message = "hqd,hkd->hqk"}> : () -> ()
    %cst_29 = arith.constant dense<0.000000e+00> : vector<4x8x8xf32>
    %83 = tpu.matmul %62, %72, %cst_29 {dimension_numbers = #tpu.dot_dimension_numbers<[2], [2], [1], [1], [0, 0, 0, 1, 1, 1], [0], [0]>} : vector<4x8x32xbf16>, vector<4x8x32xbf16>, vector<4x8x8xf32> -> vector<4x8x8xf32>
    "tpu.trace_stop"() : () -> ()
    %84 = vector.broadcast %43 : vector<1x1x8xf32> to vector<4x8x8xf32>
    %85 = arith.addf %83, %84 : vector<4x8x8xf32>
    %cst_30 = arith.constant dense<0xFF800000> : vector<4x8xf32>
    %86 = vector.multi_reduction <maximumf>, %85, %cst_30 [2] : vector<4x8x8xf32> to vector<4x8xf32>
    %87 = vector.shape_cast %86 : vector<4x8xf32> to vector<4x8x1xf32>
    %88 = vector.broadcast %87 : vector<4x8x1xf32> to vector<4x8x8xf32>
    %89 = arith.subf %85, %88 : vector<4x8x8xf32>
    %90 = math.exp %89 : vector<4x8x8xf32>
    %cst_31 = arith.constant dense<0.000000e+00> : vector<4x8xf32>
    %91 = vector.multi_reduction <add>, %90, %cst_31 [2] : vector<4x8x8xf32> to vector<4x8xf32>
    %92 = vector.shape_cast %91 : vector<4x8xf32> to vector<4x8x1xf32>
    %93 = tpu.reciprocal %92 {approx = true} : vector<4x8x1xf32> -> vector<4x8x1xf32>
    %94 = vector.broadcast %93 : vector<4x8x1xf32> to vector<4x8x8xf32>
    %95 = arith.mulf %90, %94 : vector<4x8x8xf32>
    %96 = arith.truncf %95 : vector<4x8x8xf32> to vector<4x8x8xbf16>
    "tpu.trace_start"() <{level = 10 : i32, message = "hqk,hkd->hqd"}> : () -> ()
    %cst_32 = arith.constant dense<0.000000e+00> : vector<4x8x32xf32>
    %97 = tpu.matmul %96, %82, %cst_32 {dimension_numbers = #tpu.dot_dimension_numbers<[2], [1], [1], [2], [0, 0, 0, 1, 1, 2], [0], [0]>} : vector<4x8x8xbf16>, vector<4x8x32xbf16>, vector<4x8x32xf32> -> vector<4x8x32xf32>
    "tpu.trace_stop"() : () -> ()
    %98 = vector.extract_strided_slice %97 {offsets = [0, 0, 0], sizes = [1, 8, 32], strides = [1, 1, 1]} : vector<4x8x32xf32> to vector<1x8x32xf32>
    %99 = vector.shape_cast %98 : vector<1x8x32xf32> to vector<8x32xf32>
    %100 = vector.extract_strided_slice %97 {offsets = [1, 0, 0], sizes = [1, 8, 32], strides = [1, 1, 1]} : vector<4x8x32xf32> to vector<1x8x32xf32>
    %101 = vector.shape_cast %100 : vector<1x8x32xf32> to vector<8x32xf32>
    %102 = vector.extract_strided_slice %97 {offsets = [2, 0, 0], sizes = [1, 8, 32], strides = [1, 1, 1]} : vector<4x8x32xf32> to vector<1x8x32xf32>
    %103 = vector.shape_cast %102 : vector<1x8x32xf32> to vector<8x32xf32>
    %104 = vector.extract_strided_slice %97 {offsets = [3, 0, 0], sizes = [1, 8, 32], strides = [1, 1, 1]} : vector<4x8x32xf32> to vector<1x8x32xf32>
    %105 = vector.shape_cast %104 : vector<1x8x32xf32> to vector<8x32xf32>
    %106 = tpu.concatenate %99, %101, %103, %105 in 1 : vector<8x32xf32>, vector<8x32xf32>, vector<8x32xf32>, vector<8x32xf32> -> vector<8x128xf32>
    %c0_33 = arith.constant 0 : index
    %c0_34 = arith.constant 0 : index
    %c0_35 = arith.constant 0 : index
    %107 = vector.load %arg9[%c0_33, %c0_34, %c0_35] : memref<2x128x128xbf16, #tpu.memory_space<vmem>>, vector<1x128x128xbf16>
    %108 = vector.shape_cast %107 : vector<1x128x128xbf16> to vector<128x128xbf16>
    %c0_36 = arith.constant 0 : index
    %c0_37 = arith.constant 0 : index
    %c0_38 = arith.constant 0 : index
    %109 = vector.load %arg10[%c0_36, %c0_37, %c0_38] : memref<2x1x128xf32, #tpu.memory_space<vmem>>, vector<1x1x128xf32>
    %110 = vector.shape_cast %109 : vector<1x1x128xf32> to vector<1x128xf32>
    %111 = arith.truncf %106 : vector<8x128xf32> to vector<8x128xbf16>
    %cst_39 = arith.constant dense<0.000000e+00> : vector<8x128xf32>
    %112 = tpu.matmul %111, %108, %cst_39 {dimension_numbers = #tpu.dot_dimension_numbers<[1], [0], [0], [1], [0, 0, 1, 1], [], []>} : vector<8x128xbf16>, vector<128x128xbf16>, vector<8x128xf32> -> vector<8x128xf32>
    %113 = vector.broadcast %110 : vector<1x128xf32> to vector<8x128xf32>
    %114 = arith.addf %112, %113 : vector<8x128xf32>
    %115 = arith.addf %114, %35 : vector<8x128xf32>
    %c0_40 = arith.constant 0 : index
    %c0_41 = arith.constant 0 : index
    %c0_42 = arith.constant 0 : index
    %116 = vector.load %arg11[%c0_40, %c0_41, %c0_42] : memref<2x1x128xf32, #tpu.memory_space<vmem>>, vector<1x1x128xf32>
    %117 = vector.shape_cast %116 : vector<1x1x128xf32> to vector<1x128xf32>
    %c0_43 = arith.constant 0 : index
    %c0_44 = arith.constant 0 : index
    %c0_45 = arith.constant 0 : index
    %118 = vector.load %arg12[%c0_43, %c0_44, %c0_45] : memref<2x1x128xf32, #tpu.memory_space<vmem>>, vector<1x1x128xf32>
    %119 = vector.shape_cast %118 : vector<1x1x128xf32> to vector<1x128xf32>
    %cst_46 = arith.constant dense<0.000000e+00> : vector<8xf32>
    %120 = vector.multi_reduction <add>, %115, %cst_46 [1] : vector<8x128xf32> to vector<8xf32>
    %121 = vector.shape_cast %120 : vector<8xf32> to vector<8x1xf32>
    %cst_47 = arith.constant 1.280000e+02 : f32
    %122 = vector.broadcast %cst_47 : f32 to vector<8x1xf32>
    %123 = arith.divf %121, %122 : vector<8x1xf32>
    %124 = vector.broadcast %123 : vector<8x1xf32> to vector<8x128xf32>
    %125 = arith.subf %115, %124 : vector<8x128xf32>
    %126 = arith.mulf %125, %125 : vector<8x128xf32>
    %cst_48 = arith.constant dense<0.000000e+00> : vector<8xf32>
    %127 = vector.multi_reduction <add>, %126, %cst_48 [1] : vector<8x128xf32> to vector<8xf32>
    %128 = vector.shape_cast %127 : vector<8xf32> to vector<8x1xf32>
    %cst_49 = arith.constant 1.280000e+02 : f32
    %129 = vector.broadcast %cst_49 : f32 to vector<8x1xf32>
    %130 = arith.divf %128, %129 : vector<8x1xf32>
    %cst_50 = arith.constant 9.99999996E-13 : f32
    %131 = vector.broadcast %cst_50 : f32 to vector<8x1xf32>
    %132 = arith.addf %130, %131 : vector<8x1xf32>
    %133 = math.rsqrt %132 : vector<8x1xf32>
    %134 = vector.broadcast %123 : vector<8x1xf32> to vector<8x128xf32>
    %135 = arith.subf %115, %134 : vector<8x128xf32>
    %136 = vector.broadcast %133 : vector<8x1xf32> to vector<8x128xf32>
    %137 = arith.mulf %135, %136 : vector<8x128xf32>
    %138 = vector.broadcast %117 : vector<1x128xf32> to vector<8x128xf32>
    %139 = arith.mulf %137, %138 : vector<8x128xf32>
    %140 = vector.broadcast %119 : vector<1x128xf32> to vector<8x128xf32>
    %141 = arith.addf %139, %140 : vector<8x128xf32>
    %c0_51 = arith.constant 0 : index
    %c0_52 = arith.constant 0 : index
    %c0_53 = arith.constant 0 : index
    %142 = vector.load %arg13[%c0_51, %c0_52, %c0_53] : memref<2x128x512xbf16, #tpu.memory_space<vmem>>, vector<1x128x512xbf16>
    %143 = vector.shape_cast %142 : vector<1x128x512xbf16> to vector<128x512xbf16>
    %c0_54 = arith.constant 0 : index
    %c0_55 = arith.constant 0 : index
    %c0_56 = arith.constant 0 : index
    %144 = vector.load %arg14[%c0_54, %c0_55, %c0_56] : memref<2x1x512xf32, #tpu.memory_space<vmem>>, vector<1x1x512xf32>
    %145 = vector.shape_cast %144 : vector<1x1x512xf32> to vector<1x512xf32>
    %146 = arith.truncf %141 : vector<8x128xf32> to vector<8x128xbf16>
    %cst_57 = arith.constant dense<0.000000e+00> : vector<8x512xf32>
    %147 = tpu.matmul %146, %143, %cst_57 {dimension_numbers = #tpu.dot_dimension_numbers<[1], [0], [0], [1], [0, 0, 1, 1], [], []>} : vector<8x128xbf16>, vector<128x512xbf16>, vector<8x512xf32> -> vector<8x512xf32>
    %148 = vector.broadcast %145 : vector<1x512xf32> to vector<8x512xf32>
    %149 = arith.addf %147, %148 : vector<8x512xf32>
    %cst_58 = arith.constant 5.000000e-01 : f32
    %150 = vector.broadcast %cst_58 : f32 to vector<8x512xf32>
    %151 = arith.mulf %150, %149 : vector<8x512xf32>
    %cst_59 = arith.constant 4.471500e-02 : f32
    %152 = vector.broadcast %cst_59 : f32 to vector<8x512xf32>
    %153 = arith.mulf %152, %149 : vector<8x512xf32>
    %154 = arith.mulf %153, %149 : vector<8x512xf32>
    %155 = arith.mulf %154, %149 : vector<8x512xf32>
    %156 = arith.addf %149, %155 : vector<8x512xf32>
    %cst_60 = arith.constant 0.797884583 : f32
    %157 = vector.broadcast %cst_60 : f32 to vector<8x512xf32>
    %158 = arith.mulf %157, %156 : vector<8x512xf32>
    %159 = math.tanh %158 : vector<8x512xf32>
    %cst_61 = arith.constant 1.000000e+00 : f32
    %160 = vector.broadcast %cst_61 : f32 to vector<8x512xf32>
    %161 = arith.addf %160, %159 : vector<8x512xf32>
    %162 = arith.mulf %151, %161 : vector<8x512xf32>
    %c0_62 = arith.constant 0 : index
    %c0_63 = arith.constant 0 : index
    %c0_64 = arith.constant 0 : index
    %163 = vector.load %arg15[%c0_62, %c0_63, %c0_64] : memref<2x512x128xbf16, #tpu.memory_space<vmem>>, vector<1x512x128xbf16>
    %164 = vector.shape_cast %163 : vector<1x512x128xbf16> to vector<512x128xbf16>
    %c0_65 = arith.constant 0 : index
    %c0_66 = arith.constant 0 : index
    %c0_67 = arith.constant 0 : index
    %165 = vector.load %arg16[%c0_65, %c0_66, %c0_67] : memref<2x1x128xf32, #tpu.memory_space<vmem>>, vector<1x1x128xf32>
    %166 = vector.shape_cast %165 : vector<1x1x128xf32> to vector<1x128xf32>
    %167 = arith.truncf %162 : vector<8x512xf32> to vector<8x512xbf16>
    %cst_68 = arith.constant dense<0.000000e+00> : vector<8x128xf32>
    %168 = tpu.matmul %167, %164, %cst_68 {dimension_numbers = #tpu.dot_dimension_numbers<[1], [0], [0], [1], [0, 0, 1, 1], [], []>} : vector<8x512xbf16>, vector<512x128xbf16>, vector<8x128xf32> -> vector<8x128xf32>
    %169 = vector.broadcast %166 : vector<1x128xf32> to vector<8x128xf32>
    %170 = arith.addf %168, %169 : vector<8x128xf32>
    %171 = arith.addf %170, %141 : vector<8x128xf32>
    %c0_69 = arith.constant 0 : index
    %c0_70 = arith.constant 0 : index
    %c0_71 = arith.constant 0 : index
    %172 = vector.load %arg17[%c0_69, %c0_70, %c0_71] : memref<2x1x128xf32, #tpu.memory_space<vmem>>, vector<1x1x128xf32>
    %173 = vector.shape_cast %172 : vector<1x1x128xf32> to vector<1x128xf32>
    %c0_72 = arith.constant 0 : index
    %c0_73 = arith.constant 0 : index
    %c0_74 = arith.constant 0 : index
    %174 = vector.load %arg18[%c0_72, %c0_73, %c0_74] : memref<2x1x128xf32, #tpu.memory_space<vmem>>, vector<1x1x128xf32>
    %175 = vector.shape_cast %174 : vector<1x1x128xf32> to vector<1x128xf32>
    %cst_75 = arith.constant dense<0.000000e+00> : vector<8xf32>
    %176 = vector.multi_reduction <add>, %171, %cst_75 [1] : vector<8x128xf32> to vector<8xf32>
    %177 = vector.shape_cast %176 : vector<8xf32> to vector<8x1xf32>
    %cst_76 = arith.constant 1.280000e+02 : f32
    %178 = vector.broadcast %cst_76 : f32 to vector<8x1xf32>
    %179 = arith.divf %177, %178 : vector<8x1xf32>
    %180 = vector.broadcast %179 : vector<8x1xf32> to vector<8x128xf32>
    %181 = arith.subf %171, %180 : vector<8x128xf32>
    %182 = arith.mulf %181, %181 : vector<8x128xf32>
    %cst_77 = arith.constant dense<0.000000e+00> : vector<8xf32>
    %183 = vector.multi_reduction <add>, %182, %cst_77 [1] : vector<8x128xf32> to vector<8xf32>
    %184 = vector.shape_cast %183 : vector<8xf32> to vector<8x1xf32>
    %cst_78 = arith.constant 1.280000e+02 : f32
    %185 = vector.broadcast %cst_78 : f32 to vector<8x1xf32>
    %186 = arith.divf %184, %185 : vector<8x1xf32>
    %cst_79 = arith.constant 9.99999996E-13 : f32
    %187 = vector.broadcast %cst_79 : f32 to vector<8x1xf32>
    %188 = arith.addf %186, %187 : vector<8x1xf32>
    %189 = math.rsqrt %188 : vector<8x1xf32>
    %190 = vector.broadcast %179 : vector<8x1xf32> to vector<8x128xf32>
    %191 = arith.subf %171, %190 : vector<8x128xf32>
    %192 = vector.broadcast %189 : vector<8x1xf32> to vector<8x128xf32>
    %193 = arith.mulf %191, %192 : vector<8x128xf32>
    %194 = vector.broadcast %173 : vector<1x128xf32> to vector<8x128xf32>
    %195 = arith.mulf %193, %194 : vector<8x128xf32>
    %196 = vector.broadcast %175 : vector<1x128xf32> to vector<8x128xf32>
    %197 = arith.addf %195, %196 : vector<8x128xf32>
    %c1 = arith.constant 1 : index
    %c0_80 = arith.constant 0 : index
    %c0_81 = arith.constant 0 : index
    %198 = vector.load %arg7[%c1, %c0_80, %c0_81] : memref<2x128x384xbf16, #tpu.memory_space<vmem>>, vector<1x128x384xbf16>
    %199 = vector.shape_cast %198 : vector<1x128x384xbf16> to vector<128x384xbf16>
    %c1_82 = arith.constant 1 : index
    %c0_83 = arith.constant 0 : index
    %c0_84 = arith.constant 0 : index
    %200 = vector.load %arg8[%c1_82, %c0_83, %c0_84] : memref<2x1x384xf32, #tpu.memory_space<vmem>>, vector<1x1x384xf32>
    %201 = vector.shape_cast %200 : vector<1x1x384xf32> to vector<1x384xf32>
    %202 = arith.truncf %197 : vector<8x128xf32> to vector<8x128xbf16>
    %cst_85 = arith.constant dense<0.000000e+00> : vector<8x384xf32>
    %203 = tpu.matmul %202, %199, %cst_85 {dimension_numbers = #tpu.dot_dimension_numbers<[1], [0], [0], [1], [0, 0, 1, 1], [], []>} : vector<8x128xbf16>, vector<128x384xbf16>, vector<8x384xf32> -> vector<8x384xf32>
    %204 = vector.broadcast %201 : vector<1x384xf32> to vector<8x384xf32>
    %205 = arith.addf %203, %204 : vector<8x384xf32>
    %206 = arith.truncf %205 : vector<8x384xf32> to vector<8x384xbf16>
    %207 = vector.extract_strided_slice %206 {offsets = [0, 0], sizes = [8, 128], strides = [1, 1]} : vector<8x384xbf16> to vector<8x128xbf16>
    %208 = vector.extract_strided_slice %207 {offsets = [0, 0], sizes = [8, 32], strides = [1, 1]} : vector<8x128xbf16> to vector<8x32xbf16>
    %209 = vector.extract_strided_slice %207 {offsets = [0, 32], sizes = [8, 32], strides = [1, 1]} : vector<8x128xbf16> to vector<8x32xbf16>
    %210 = vector.extract_strided_slice %207 {offsets = [0, 64], sizes = [8, 32], strides = [1, 1]} : vector<8x128xbf16> to vector<8x32xbf16>
    %211 = vector.extract_strided_slice %207 {offsets = [0, 96], sizes = [8, 32], strides = [1, 1]} : vector<8x128xbf16> to vector<8x32xbf16>
    %212 = vector.shape_cast %208 : vector<8x32xbf16> to vector<1x8x32xbf16>
    %213 = vector.shape_cast %209 : vector<8x32xbf16> to vector<1x8x32xbf16>
    %214 = vector.shape_cast %210 : vector<8x32xbf16> to vector<1x8x32xbf16>
    %215 = vector.shape_cast %211 : vector<8x32xbf16> to vector<1x8x32xbf16>
    %216 = tpu.concatenate %212, %213, %214, %215 in 0 : vector<1x8x32xbf16>, vector<1x8x32xbf16>, vector<1x8x32xbf16>, vector<1x8x32xbf16> -> vector<4x8x32xbf16>
    %217 = vector.extract_strided_slice %206 {offsets = [0, 128], sizes = [8, 128], strides = [1, 1]} : vector<8x384xbf16> to vector<8x128xbf16>
    %218 = vector.extract_strided_slice %217 {offsets = [0, 0], sizes = [8, 32], strides = [1, 1]} : vector<8x128xbf16> to vector<8x32xbf16>
    %219 = vector.extract_strided_slice %217 {offsets = [0, 32], sizes = [8, 32], strides = [1, 1]} : vector<8x128xbf16> to vector<8x32xbf16>
    %220 = vector.extract_strided_slice %217 {offsets = [0, 64], sizes = [8, 32], strides = [1, 1]} : vector<8x128xbf16> to vector<8x32xbf16>
    %221 = vector.extract_strided_slice %217 {offsets = [0, 96], sizes = [8, 32], strides = [1, 1]} : vector<8x128xbf16> to vector<8x32xbf16>
    %222 = vector.shape_cast %218 : vector<8x32xbf16> to vector<1x8x32xbf16>
    %223 = vector.shape_cast %219 : vector<8x32xbf16> to vector<1x8x32xbf16>
    %224 = vector.shape_cast %220 : vector<8x32xbf16> to vector<1x8x32xbf16>
    %225 = vector.shape_cast %221 : vector<8x32xbf16> to vector<1x8x32xbf16>
    %226 = tpu.concatenate %222, %223, %224, %225 in 0 : vector<1x8x32xbf16>, vector<1x8x32xbf16>, vector<1x8x32xbf16>, vector<1x8x32xbf16> -> vector<4x8x32xbf16>
    %227 = vector.extract_strided_slice %206 {offsets = [0, 256], sizes = [8, 128], strides = [1, 1]} : vector<8x384xbf16> to vector<8x128xbf16>
    %228 = vector.extract_strided_slice %227 {offsets = [0, 0], sizes = [8, 32], strides = [1, 1]} : vector<8x128xbf16> to vector<8x32xbf16>
    %229 = vector.extract_strided_slice %227 {offsets = [0, 32], sizes = [8, 32], strides = [1, 1]} : vector<8x128xbf16> to vector<8x32xbf16>
    %230 = vector.extract_strided_slice %227 {offsets = [0, 64], sizes = [8, 32], strides = [1, 1]} : vector<8x128xbf16> to vector<8x32xbf16>
    %231 = vector.extract_strided_slice %227 {offsets = [0, 96], sizes = [8, 32], strides = [1, 1]} : vector<8x128xbf16> to vector<8x32xbf16>
    %232 = vector.shape_cast %228 : vector<8x32xbf16> to vector<1x8x32xbf16>
    %233 = vector.shape_cast %229 : vector<8x32xbf16> to vector<1x8x32xbf16>
    %234 = vector.shape_cast %230 : vector<8x32xbf16> to vector<1x8x32xbf16>
    %235 = vector.shape_cast %231 : vector<8x32xbf16> to vector<1x8x32xbf16>
    %236 = tpu.concatenate %232, %233, %234, %235 in 0 : vector<1x8x32xbf16>, vector<1x8x32xbf16>, vector<1x8x32xbf16>, vector<1x8x32xbf16> -> vector<4x8x32xbf16>
    "tpu.trace_start"() <{level = 10 : i32, message = "hqd,hkd->hqk"}> : () -> ()
    %cst_86 = arith.constant dense<0.000000e+00> : vector<4x8x8xf32>
    %237 = tpu.matmul %216, %226, %cst_86 {dimension_numbers = #tpu.dot_dimension_numbers<[2], [2], [1], [1], [0, 0, 0, 1, 1, 1], [0], [0]>} : vector<4x8x32xbf16>, vector<4x8x32xbf16>, vector<4x8x8xf32> -> vector<4x8x8xf32>
    "tpu.trace_stop"() : () -> ()
    %238 = vector.broadcast %43 : vector<1x1x8xf32> to vector<4x8x8xf32>
    %239 = arith.addf %237, %238 : vector<4x8x8xf32>
    %cst_87 = arith.constant dense<0xFF800000> : vector<4x8xf32>
    %240 = vector.multi_reduction <maximumf>, %239, %cst_87 [2] : vector<4x8x8xf32> to vector<4x8xf32>
    %241 = vector.shape_cast %240 : vector<4x8xf32> to vector<4x8x1xf32>
    %242 = vector.broadcast %241 : vector<4x8x1xf32> to vector<4x8x8xf32>
    %243 = arith.subf %239, %242 : vector<4x8x8xf32>
    %244 = math.exp %243 : vector<4x8x8xf32>
    %cst_88 = arith.constant dense<0.000000e+00> : vector<4x8xf32>
    %245 = vector.multi_reduction <add>, %244, %cst_88 [2] : vector<4x8x8xf32> to vector<4x8xf32>
    %246 = vector.shape_cast %245 : vector<4x8xf32> to vector<4x8x1xf32>
    %247 = tpu.reciprocal %246 {approx = true} : vector<4x8x1xf32> -> vector<4x8x1xf32>
    %248 = vector.broadcast %247 : vector<4x8x1xf32> to vector<4x8x8xf32>
    %249 = arith.mulf %244, %248 : vector<4x8x8xf32>
    %250 = arith.truncf %249 : vector<4x8x8xf32> to vector<4x8x8xbf16>
    "tpu.trace_start"() <{level = 10 : i32, message = "hqk,hkd->hqd"}> : () -> ()
    %cst_89 = arith.constant dense<0.000000e+00> : vector<4x8x32xf32>
    %251 = tpu.matmul %250, %236, %cst_89 {dimension_numbers = #tpu.dot_dimension_numbers<[2], [1], [1], [2], [0, 0, 0, 1, 1, 2], [0], [0]>} : vector<4x8x8xbf16>, vector<4x8x32xbf16>, vector<4x8x32xf32> -> vector<4x8x32xf32>
    "tpu.trace_stop"() : () -> ()
    %252 = vector.extract_strided_slice %251 {offsets = [0, 0, 0], sizes = [1, 8, 32], strides = [1, 1, 1]} : vector<4x8x32xf32> to vector<1x8x32xf32>
    %253 = vector.shape_cast %252 : vector<1x8x32xf32> to vector<8x32xf32>
    %254 = vector.extract_strided_slice %251 {offsets = [1, 0, 0], sizes = [1, 8, 32], strides = [1, 1, 1]} : vector<4x8x32xf32> to vector<1x8x32xf32>
    %255 = vector.shape_cast %254 : vector<1x8x32xf32> to vector<8x32xf32>
    %256 = vector.extract_strided_slice %251 {offsets = [2, 0, 0], sizes = [1, 8, 32], strides = [1, 1, 1]} : vector<4x8x32xf32> to vector<1x8x32xf32>
    %257 = vector.shape_cast %256 : vector<1x8x32xf32> to vector<8x32xf32>
    %258 = vector.extract_strided_slice %251 {offsets = [3, 0, 0], sizes = [1, 8, 32], strides = [1, 1, 1]} : vector<4x8x32xf32> to vector<1x8x32xf32>
    %259 = vector.shape_cast %258 : vector<1x8x32xf32> to vector<8x32xf32>
    %260 = tpu.concatenate %253, %255, %257, %259 in 1 : vector<8x32xf32>, vector<8x32xf32>, vector<8x32xf32>, vector<8x32xf32> -> vector<8x128xf32>
    %c1_90 = arith.constant 1 : index
    %c0_91 = arith.constant 0 : index
    %c0_92 = arith.constant 0 : index
    %261 = vector.load %arg9[%c1_90, %c0_91, %c0_92] : memref<2x128x128xbf16, #tpu.memory_space<vmem>>, vector<1x128x128xbf16>
    %262 = vector.shape_cast %261 : vector<1x128x128xbf16> to vector<128x128xbf16>
    %c1_93 = arith.constant 1 : index
    %c0_94 = arith.constant 0 : index
    %c0_95 = arith.constant 0 : index
    %263 = vector.load %arg10[%c1_93, %c0_94, %c0_95] : memref<2x1x128xf32, #tpu.memory_space<vmem>>, vector<1x1x128xf32>
    %264 = vector.shape_cast %263 : vector<1x1x128xf32> to vector<1x128xf32>
    %265 = arith.truncf %260 : vector<8x128xf32> to vector<8x128xbf16>
    %cst_96 = arith.constant dense<0.000000e+00> : vector<8x128xf32>
    %266 = tpu.matmul %265, %262, %cst_96 {dimension_numbers = #tpu.dot_dimension_numbers<[1], [0], [0], [1], [0, 0, 1, 1], [], []>} : vector<8x128xbf16>, vector<128x128xbf16>, vector<8x128xf32> -> vector<8x128xf32>
    %267 = vector.broadcast %264 : vector<1x128xf32> to vector<8x128xf32>
    %268 = arith.addf %266, %267 : vector<8x128xf32>
    %269 = arith.addf %268, %197 : vector<8x128xf32>
    %c1_97 = arith.constant 1 : index
    %c0_98 = arith.constant 0 : index
    %c0_99 = arith.constant 0 : index
    %270 = vector.load %arg11[%c1_97, %c0_98, %c0_99] : memref<2x1x128xf32, #tpu.memory_space<vmem>>, vector<1x1x128xf32>
    %271 = vector.shape_cast %270 : vector<1x1x128xf32> to vector<1x128xf32>
    %c1_100 = arith.constant 1 : index
    %c0_101 = arith.constant 0 : index
    %c0_102 = arith.constant 0 : index
    %272 = vector.load %arg12[%c1_100, %c0_101, %c0_102] : memref<2x1x128xf32, #tpu.memory_space<vmem>>, vector<1x1x128xf32>
    %273 = vector.shape_cast %272 : vector<1x1x128xf32> to vector<1x128xf32>
    %cst_103 = arith.constant dense<0.000000e+00> : vector<8xf32>
    %274 = vector.multi_reduction <add>, %269, %cst_103 [1] : vector<8x128xf32> to vector<8xf32>
    %275 = vector.shape_cast %274 : vector<8xf32> to vector<8x1xf32>
    %cst_104 = arith.constant 1.280000e+02 : f32
    %276 = vector.broadcast %cst_104 : f32 to vector<8x1xf32>
    %277 = arith.divf %275, %276 : vector<8x1xf32>
    %278 = vector.broadcast %277 : vector<8x1xf32> to vector<8x128xf32>
    %279 = arith.subf %269, %278 : vector<8x128xf32>
    %280 = arith.mulf %279, %279 : vector<8x128xf32>
    %cst_105 = arith.constant dense<0.000000e+00> : vector<8xf32>
    %281 = vector.multi_reduction <add>, %280, %cst_105 [1] : vector<8x128xf32> to vector<8xf32>
    %282 = vector.shape_cast %281 : vector<8xf32> to vector<8x1xf32>
    %cst_106 = arith.constant 1.280000e+02 : f32
    %283 = vector.broadcast %cst_106 : f32 to vector<8x1xf32>
    %284 = arith.divf %282, %283 : vector<8x1xf32>
    %cst_107 = arith.constant 9.99999996E-13 : f32
    %285 = vector.broadcast %cst_107 : f32 to vector<8x1xf32>
    %286 = arith.addf %284, %285 : vector<8x1xf32>
    %287 = math.rsqrt %286 : vector<8x1xf32>
    %288 = vector.broadcast %277 : vector<8x1xf32> to vector<8x128xf32>
    %289 = arith.subf %269, %288 : vector<8x128xf32>
    %290 = vector.broadcast %287 : vector<8x1xf32> to vector<8x128xf32>
    %291 = arith.mulf %289, %290 : vector<8x128xf32>
    %292 = vector.broadcast %271 : vector<1x128xf32> to vector<8x128xf32>
    %293 = arith.mulf %291, %292 : vector<8x128xf32>
    %294 = vector.broadcast %273 : vector<1x128xf32> to vector<8x128xf32>
    %295 = arith.addf %293, %294 : vector<8x128xf32>
    %c1_108 = arith.constant 1 : index
    %c0_109 = arith.constant 0 : index
    %c0_110 = arith.constant 0 : index
    %296 = vector.load %arg13[%c1_108, %c0_109, %c0_110] : memref<2x128x512xbf16, #tpu.memory_space<vmem>>, vector<1x128x512xbf16>
    %297 = vector.shape_cast %296 : vector<1x128x512xbf16> to vector<128x512xbf16>
    %c1_111 = arith.constant 1 : index
    %c0_112 = arith.constant 0 : index
    %c0_113 = arith.constant 0 : index
    %298 = vector.load %arg14[%c1_111, %c0_112, %c0_113] : memref<2x1x512xf32, #tpu.memory_space<vmem>>, vector<1x1x512xf32>
    %299 = vector.shape_cast %298 : vector<1x1x512xf32> to vector<1x512xf32>
    %300 = arith.truncf %295 : vector<8x128xf32> to vector<8x128xbf16>
    %cst_114 = arith.constant dense<0.000000e+00> : vector<8x512xf32>
    %301 = tpu.matmul %300, %297, %cst_114 {dimension_numbers = #tpu.dot_dimension_numbers<[1], [0], [0], [1], [0, 0, 1, 1], [], []>} : vector<8x128xbf16>, vector<128x512xbf16>, vector<8x512xf32> -> vector<8x512xf32>
    %302 = vector.broadcast %299 : vector<1x512xf32> to vector<8x512xf32>
    %303 = arith.addf %301, %302 : vector<8x512xf32>
    %cst_115 = arith.constant 5.000000e-01 : f32
    %304 = vector.broadcast %cst_115 : f32 to vector<8x512xf32>
    %305 = arith.mulf %304, %303 : vector<8x512xf32>
    %cst_116 = arith.constant 4.471500e-02 : f32
    %306 = vector.broadcast %cst_116 : f32 to vector<8x512xf32>
    %307 = arith.mulf %306, %303 : vector<8x512xf32>
    %308 = arith.mulf %307, %303 : vector<8x512xf32>
    %309 = arith.mulf %308, %303 : vector<8x512xf32>
    %310 = arith.addf %303, %309 : vector<8x512xf32>
    %cst_117 = arith.constant 0.797884583 : f32
    %311 = vector.broadcast %cst_117 : f32 to vector<8x512xf32>
    %312 = arith.mulf %311, %310 : vector<8x512xf32>
    %313 = math.tanh %312 : vector<8x512xf32>
    %cst_118 = arith.constant 1.000000e+00 : f32
    %314 = vector.broadcast %cst_118 : f32 to vector<8x512xf32>
    %315 = arith.addf %314, %313 : vector<8x512xf32>
    %316 = arith.mulf %305, %315 : vector<8x512xf32>
    %c1_119 = arith.constant 1 : index
    %c0_120 = arith.constant 0 : index
    %c0_121 = arith.constant 0 : index
    %317 = vector.load %arg15[%c1_119, %c0_120, %c0_121] : memref<2x512x128xbf16, #tpu.memory_space<vmem>>, vector<1x512x128xbf16>
    %318 = vector.shape_cast %317 : vector<1x512x128xbf16> to vector<512x128xbf16>
    %c1_122 = arith.constant 1 : index
    %c0_123 = arith.constant 0 : index
    %c0_124 = arith.constant 0 : index
    %319 = vector.load %arg16[%c1_122, %c0_123, %c0_124] : memref<2x1x128xf32, #tpu.memory_space<vmem>>, vector<1x1x128xf32>
    %320 = vector.shape_cast %319 : vector<1x1x128xf32> to vector<1x128xf32>
    %321 = arith.truncf %316 : vector<8x512xf32> to vector<8x512xbf16>
    %cst_125 = arith.constant dense<0.000000e+00> : vector<8x128xf32>
    %322 = tpu.matmul %321, %318, %cst_125 {dimension_numbers = #tpu.dot_dimension_numbers<[1], [0], [0], [1], [0, 0, 1, 1], [], []>} : vector<8x512xbf16>, vector<512x128xbf16>, vector<8x128xf32> -> vector<8x128xf32>
    %323 = vector.broadcast %320 : vector<1x128xf32> to vector<8x128xf32>
    %324 = arith.addf %322, %323 : vector<8x128xf32>
    %325 = arith.addf %324, %295 : vector<8x128xf32>
    %c1_126 = arith.constant 1 : index
    %c0_127 = arith.constant 0 : index
    %c0_128 = arith.constant 0 : index
    %326 = vector.load %arg17[%c1_126, %c0_127, %c0_128] : memref<2x1x128xf32, #tpu.memory_space<vmem>>, vector<1x1x128xf32>
    %327 = vector.shape_cast %326 : vector<1x1x128xf32> to vector<1x128xf32>
    %c1_129 = arith.constant 1 : index
    %c0_130 = arith.constant 0 : index
    %c0_131 = arith.constant 0 : index
    %328 = vector.load %arg18[%c1_129, %c0_130, %c0_131] : memref<2x1x128xf32, #tpu.memory_space<vmem>>, vector<1x1x128xf32>
    %329 = vector.shape_cast %328 : vector<1x1x128xf32> to vector<1x128xf32>
    %cst_132 = arith.constant dense<0.000000e+00> : vector<8xf32>
    %330 = vector.multi_reduction <add>, %325, %cst_132 [1] : vector<8x128xf32> to vector<8xf32>
    %331 = vector.shape_cast %330 : vector<8xf32> to vector<8x1xf32>
    %cst_133 = arith.constant 1.280000e+02 : f32
    %332 = vector.broadcast %cst_133 : f32 to vector<8x1xf32>
    %333 = arith.divf %331, %332 : vector<8x1xf32>
    %334 = vector.broadcast %333 : vector<8x1xf32> to vector<8x128xf32>
    %335 = arith.subf %325, %334 : vector<8x128xf32>
    %336 = arith.mulf %335, %335 : vector<8x128xf32>
    %cst_134 = arith.constant dense<0.000000e+00> : vector<8xf32>
    %337 = vector.multi_reduction <add>, %336, %cst_134 [1] : vector<8x128xf32> to vector<8xf32>
    %338 = vector.shape_cast %337 : vector<8xf32> to vector<8x1xf32>
    %cst_135 = arith.constant 1.280000e+02 : f32
    %339 = vector.broadcast %cst_135 : f32 to vector<8x1xf32>
    %340 = arith.divf %338, %339 : vector<8x1xf32>
    %cst_136 = arith.constant 9.99999996E-13 : f32
    %341 = vector.broadcast %cst_136 : f32 to vector<8x1xf32>
    %342 = arith.addf %340, %341 : vector<8x1xf32>
    %343 = math.rsqrt %342 : vector<8x1xf32>
    %344 = vector.broadcast %333 : vector<8x1xf32> to vector<8x128xf32>
    %345 = arith.subf %325, %344 : vector<8x128xf32>
    %346 = vector.broadcast %343 : vector<8x1xf32> to vector<8x128xf32>
    %347 = arith.mulf %345, %346 : vector<8x128xf32>
    %348 = vector.broadcast %327 : vector<1x128xf32> to vector<8x128xf32>
    %349 = arith.mulf %347, %348 : vector<8x128xf32>
    %350 = vector.broadcast %329 : vector<1x128xf32> to vector<8x128xf32>
    %351 = arith.addf %349, %350 : vector<8x128xf32>
    %cst_137 = arith.constant dense<0.000000e+00> : vector<128xf32>
    %352 = vector.multi_reduction <add>, %351, %cst_137 [0] : vector<8x128xf32> to vector<128xf32>
    %353 = vector.shape_cast %352 : vector<128xf32> to vector<1x128xf32>
    %cst_138 = arith.constant 8.000000e+00 : f32
    %354 = vector.broadcast %cst_138 : f32 to vector<1x128xf32>
    %355 = arith.divf %353, %354 : vector<1x128xf32>
    %356 = vector.shape_cast %355 : vector<1x128xf32> to vector<1x1x128xf32>
    %c0_139 = arith.constant 0 : index
    %c0_140 = arith.constant 0 : index
    %c0_141 = arith.constant 0 : index
    %357 = vector.load %arg19[%c0_139, %c0_140, %c0_141] : memref<1x1x128xf32, #tpu.memory_space<vmem>>, vector<1x1x128xf32>
    tpu.vector_store %arg19[%c0_139, %c0_140, %c0_141], %356 {strides = array<i32>} : memref<1x1x128xf32, #tpu.memory_space<vmem>>, vector<1x1x128xf32>,
    return
  }
  func.func @transform_0(%arg0: i32) -> (i32, i32, i32) {
    %c0_i32 = arith.constant 0 : i32
    %c0_i32_0 = arith.constant 0 : i32
    %c0_i32_1 = arith.constant 0 : i32
    return %arg0, %c0_i32, %c0_i32_0 : i32, i32, i32
  }
  func.func @transform_1(%arg0: i32) -> (i32, i32, i32) {
    %c0_i32 = arith.constant 0 : i32
    %c0_i32_0 = arith.constant 0 : i32
    %c0_i32_1 = arith.constant 0 : i32
    return %arg0, %c0_i32, %c0_i32_0 : i32, i32, i32
  }
  func.func @transform_2(%arg0: i32) -> (i32, i32) {
    %c0_i32 = arith.constant 0 : i32
    %c0_i32_0 = arith.constant 0 : i32
    %c0_i32_1 = arith.constant 0 : i32
    return %c0_i32, %c0_i32_0 : i32, i32
  }
  func.func @transform_3(%arg0: i32) -> (i32, i32) {
    %c0_i32 = arith.constant 0 : i32
    %c0_i32_0 = arith.constant 0 : i32
    %c0_i32_1 = arith.constant 0 : i32
    return %c0_i32, %c0_i32_0 : i32, i32
  }
  func.func @transform_4(%arg0: i32) -> (i32, i32) {
    %c0_i32 = arith.constant 0 : i32
    %c0_i32_0 = arith.constant 0 : i32
    %c0_i32_1 = arith.constant 0 : i32
    return %c0_i32, %c0_i32_0 : i32, i32
  }
  func.func @transform_5(%arg0: i32) -> (i32, i32) {
    %c0_i32 = arith.constant 0 : i32
    %c0_i32_0 = arith.constant 0 : i32
    %c0_i32_1 = arith.constant 0 : i32
    return %c0_i32, %c0_i32_0 : i32, i32
  }
  func.func @transform_6(%arg0: i32) -> (i32, i32, i32) {
    %c0_i32 = arith.constant 0 : i32
    %c0_i32_0 = arith.constant 0 : i32
    %c0_i32_1 = arith.constant 0 : i32
    %c0_i32_2 = arith.constant 0 : i32
    return %c0_i32, %c0_i32_0, %c0_i32_1 : i32, i32, i32
  }
  func.func @transform_7(%arg0: i32) -> (i32, i32, i32) {
    %c0_i32 = arith.constant 0 : i32
    %c0_i32_0 = arith.constant 0 : i32
    %c0_i32_1 = arith.constant 0 : i32
    %c0_i32_2 = arith.constant 0 : i32
    return %c0_i32, %c0_i32_0, %c0_i32_1 : i32, i32, i32
  }
  func.func @transform_8(%arg0: i32) -> (i32, i32, i32) {
    %c0_i32 = arith.constant 0 : i32
    %c0_i32_0 = arith.constant 0 : i32
    %c0_i32_1 = arith.constant 0 : i32
    %c0_i32_2 = arith.constant 0 : i32
    return %c0_i32, %c0_i32_0, %c0_i32_1 : i32, i32, i32
  }
  func.func @transform_9(%arg0: i32) -> (i32, i32, i32) {
    %c0_i32 = arith.constant 0 : i32
    %c0_i32_0 = arith.constant 0 : i32
    %c0_i32_1 = arith.constant 0 : i32
    %c0_i32_2 = arith.constant 0 : i32
    return %c0_i32, %c0_i32_0, %c0_i32_1 : i32, i32, i32
  }
  func.func @transform_10(%arg0: i32) -> (i32, i32, i32) {
    %c0_i32 = arith.constant 0 : i32
    %c0_i32_0 = arith.constant 0 : i32
    %c0_i32_1 = arith.constant 0 : i32
    %c0_i32_2 = arith.constant 0 : i32
    return %c0_i32, %c0_i32_0, %c0_i32_1 : i32, i32, i32
  }
  func.func @transform_11(%arg0: i32) -> (i32, i32, i32) {
    %c0_i32 = arith.constant 0 : i32
    %c0_i32_0 = arith.constant 0 : i32
    %c0_i32_1 = arith.constant 0 : i32
    %c0_i32_2 = arith.constant 0 : i32
    return %c0_i32, %c0_i32_0, %c0_i32_1 : i32, i32, i32
  }
  func.func @transform_12(%arg0: i32) -> (i32, i32, i32) {
    %c0_i32 = arith.constant 0 : i32
    %c0_i32_0 = arith.constant 0 : i32
    %c0_i32_1 = arith.constant 0 : i32
    %c0_i32_2 = arith.constant 0 : i32
    return %c0_i32, %c0_i32_0, %c0_i32_1 : i32, i32, i32
  }
  func.func @transform_13(%arg0: i32) -> (i32, i32, i32) {
    %c0_i32 = arith.constant 0 : i32
    %c0_i32_0 = arith.constant 0 : i32
    %c0_i32_1 = arith.constant 0 : i32
    %c0_i32_2 = arith.constant 0 : i32
    return %c0_i32, %c0_i32_0, %c0_i32_1 : i32, i32, i32
  }
  func.func @transform_14(%arg0: i32) -> (i32, i32, i32) {
    %c0_i32 = arith.constant 0 : i32
    %c0_i32_0 = arith.constant 0 : i32
    %c0_i32_1 = arith.constant 0 : i32
    %c0_i32_2 = arith.constant 0 : i32
    return %c0_i32, %c0_i32_0, %c0_i32_1 : i32, i32, i32
  }
  func.func @transform_15(%arg0: i32) -> (i32, i32, i32) {
    %c0_i32 = arith.constant 0 : i32
    %c0_i32_0 = arith.constant 0 : i32
    %c0_i32_1 = arith.constant 0 : i32
    %c0_i32_2 = arith.constant 0 : i32
    return %c0_i32, %c0_i32_0, %c0_i32_1 : i32, i32, i32
  }
  func.func @transform_16(%arg0: i32) -> (i32, i32, i32) {
    %c0_i32 = arith.constant 0 : i32
    %c0_i32_0 = arith.constant 0 : i32
    %c0_i32_1 = arith.constant 0 : i32
    %c0_i32_2 = arith.constant 0 : i32
    return %c0_i32, %c0_i32_0, %c0_i32_1 : i32, i32, i32
  }
  func.func @transform_17(%arg0: i32) -> (i32, i32, i32) {
    %c0_i32 = arith.constant 0 : i32
    %c0_i32_0 = arith.constant 0 : i32
    %c0_i32_1 = arith.constant 0 : i32
    %c0_i32_2 = arith.constant 0 : i32
    return %c0_i32, %c0_i32_0, %c0_i32_1 : i32, i32, i32
  }
  func.func @transform_18(%arg0: i32) -> (i32, i32, i32) {
    %c0_i32 = arith.constant 0 : i32
    %c0_i32_0 = arith.constant 0 : i32
    %c0_i32_1 = arith.constant 0 : i32
    return %arg0, %c0_i32, %c0_i32_0 : i32, i32, i32
  }
}

</mosaic_0001>

<bundles_post_ra>
// kernel: _lambda_.1
= control target key start
LH: loop header
LB: loop body
LE: loop exit
PB: predicated region body
PF: predicated region fallthrough
CT: control target
= control target key end

     0   :  { %s6286_s0 = inlined_call_operand.vmem [shape: s32[2,8,1], index: 0, kind: input, shape index: {}]   ;;  %s6287_s1 = inlined_call_operand.vmem [shape: s32[2,1,8], index: 1, kind: input, shape index: {}]   ;;  %s6288_s2 = inlined_call_operand.vmem [shape: f32[128,128], index: 2, kind: input, shape index: {}]   ;;  %s6289_s3 = inlined_call_operand.vmem [shape: f32[8,128], index: 3, kind: input, shape index: {}]   ;;  %s6290_s4 = inlined_call_operand.vmem [shape: f32[1,128], index: 4, kind: input, shape index: {}]   ;;  %s6291_s5 = inlined_call_operand.vmem [shape: f32[1,128], index: 5, kind: input, shape index: {}]   ;;  %s6292_s6 = inlined_call_operand.vmem [shape: bf16[2,128,384], index: 6, kind: input, shape index: {}]   ;;  %s6293_s7 = inlined_call_operand.vmem [shape: f32[2,1,384], index: 7, kind: input, shape index: {}]   ;;  %s6294_s8 = inlined_call_operand.vmem [shape: bf16[2,128,128], index: 8, kind: input, shape index: {}]   ;;  %s6295_s9 = inlined_call_operand.vmem [shape: f32[2,1,128], index: 9, kind: input, shape index: {}, may-alias: {9,11,15,17}]   ;;  %s6296_s10 = inlined_call_operand.vmem [shape: f32[2,1,128], index: 10, kind: input, shape index: {}, may-alias: {10,16}]   ;;  %s6297_s11 = inlined_call_operand.vmem [shape: f32[2,1,128], index: 11, kind: input, shape index: {}, may-alias: {9,11,15,17}]   ;;  %s6298_s12 = inlined_call_operand.vmem [shape: bf16[2,128,512], index: 12, kind: input, shape index: {}]   ;;  %s6299_s13 = inlined_call_operand.vmem [shape: f32[2,1,512], index: 13, kind: input, shape index: {}]   ;;  %s6300_s14 = inlined_call_operand.vmem [shape: bf16[2,512,128], index: 14, kind: input, shape index: {}]   ;;  %s6301_s15 = inlined_call_operand.vmem [shape: f32[2,1,128], index: 15, kind: input, shape index: {}, may-alias: {9,11,15,17}]   ;;  %s6302_s16 = inlined_call_operand.vmem [shape: f32[2,1,128], index: 16, kind: input, shape index: {}, may-alias: {10,16}]   ;;  %s6303_s17 = inlined_call_operand.vmem [shape: f32[2,1,128], index: 17, kind: input, shape index: {}, may-alias: {9,11,15,17}]   ;;  %s6304_s18 = inlined_call_operand.hbm [shape: f32[2,1,128], index: 18, kind: output, shape index: {}]  }
   0x1   :  { %6319 = sst [smem:[#allocation12_spill]] %s6286_s0 }
   0x2   :  { %6320 = sst [smem:[#allocation13_spill]] %s6287_s1 }
   0x3   :  { %6321 = sst [smem:[#allocation14_spill]] %s6288_s2 }
   0x4   :  { %6322 = sst [smem:[#allocation15_spill]] %s6289_s3 }
   0x5   :  { %6323 = sst [smem:[#allocation16_spill]] %s6304_s18 }
   0x6   :  { %23 = vsyncpa [#allocation3], 0 }
   0x7   :  { %25 = vsyncpa [#allocation3 + $0x1], 0  ;;  %s5250_s27 = smov 0   ;;  %s5252_s28 = smov 0  }
   0x8   :  { %s5254_s29 = smov 0   ;;  %s5256_s30 = smov 0  }
   0x9 LB: > { %6324 = sst [smem:[#allocation5_spill]] %s5132_s27  ;;  %s5271_s0 = sadd.s32 4294967295, %s5144_s30   ;;  %s5144_s30 = sphi %s5256_s30, %s6345_s30   ;;  %s5140_s29 = sphi %s5254_s29, %s6347_s29   ;;  %s5136_s28 = sphi %s5252_s28, %s6349_s28   ;;  %s5132_s27 = sphi %s5250_s27, %s6348_s27  }
   0xa   : > { %6325 = sst [smem:[#allocation6_spill]] %s5140_s29  ;;  %s3945_s19 = sadd.s32 4294967294, %s5144_s30  }
   0xb   : > { %6326 = sst [smem:[#allocation7_spill]] %s5144_s30  ;;  %s5275_s1 = sadd.s32 1, %s5144_s30  }
   0xc   : > { %6327 = sst [smem:[#allocation8_spill]] %s5275_s1  ;;  %s426_s20 = sadd.s32 1, %s5140_s29 }
   0xd   : > { %s423_s21 = ssub.s32 %s5144_s30, %s5275_s1  ;;  %p436_p0 = scmp.ne.s32.totalorder %s5140_s29, %s5136_s28 }
   0xe   : > { %p424_p1 = scmp.eq.s32.totalorder %s423_s21, 0  ;;  %p437_p2 = scmp.eq.s32.totalorder %s5271_s0, 1 }
   0xf   : > { %p442_p3 = scmp.ne.s32.totalorder %s5136_s28, %s5132_s27  ;;  %p443_p4 = scmp.eq.s32.totalorder %s3945_s19, 1 }
  0x10   : > { %s5286_s22 = scalar_select %p424_p1, %s5140_s29, %s426_s20  }
  0x11   : > { %p5288_p5 = por %p437_p2, %p436_p0  ;;  %p5292_p6 = por %p443_p4, %p442_p3 }
  0x12   : > { %6328 = sst [smem:[#allocation9_spill]] %s5286_s22  ;;  %p3948_p7 = scmp.ge.s32.totalorder %s5144_s30, 1 }
  0x13   : > { %s6329_s2 = scalar_select %p5288_p5, 1, 0 }
  0x14   : > { %s6331_s23 = scalar_select %p5292_p6, 1, 0 }
  0x15   : > { %6330 = sst [smem:[#allocation10_spill]] %s6329_s2  ;;  %p522_p8 = scmp.lt.s32.totalorder %s5144_s30, 3 }
  0x16   : > { %6332 = sst [smem:[#allocation11_spill]] %s6331_s23 }
  0x17   : > { %p523_p9 = pnand %p3948_p7, %p522_p8 }
  0x18   : > { %p577_p10 = scmp.lt.s32.totalorder (!%p523_p9), %s5271_s0, 1  ;;  %s6333_s26 = sld [smem:[#allocation14_spill]] (!%p523_p9)  ;;  %v5146_v3 = vmov (!%p523_p9), 0   ;;  %v5147_v4 = vmov (!%p523_p9), 0.0|0.0   ;;  %vm5148_vm0 = vmmov (!%p523_p9), 0   ;;  %v5149_v14 = vmov (!%p523_p9), 0.0  }
  0x19   : > { %526 = sbr.rel (%p523_p9) target bundleno = 5837 (0x16cd), region = 92  ;;  %4783 = vset.pattern.permute.xlu0 (!%p523_p9), %v5146_v3  ;;  %4712 = vmatprep.subr.bf16.mxu0 (!%p523_p9), %v5147_v4  ;;  %s6334_s1 = sld [smem:[#allocation12_spill]] (!%p523_p9)  ;;  %v586_v28 = vlaneseq (!%p523_p9)  ;;  %v5150_v31 = vmov (!%p523_p9), 1.0   ;;  %v4784_v36 = vld [vmem:[%s6292_s6 + $0x4] ss:$12 sps:$4 sm:$0xff] (!%p523_p9)   ;;  %vm1001_vm2 = vcmask (!%p523_p9), 261120  }
  0x1a   : > { %922 = vmatprep.mubr.bf16.mxu1 (!%p523_p9), %v5146_v3  ;;  %4533 = vmatprep.mubr.msk.f32.mxu0 (!%p523_p9), %vm5148_vm0, %v5149_v14  ;;  %s6335_s3 = sld [smem:[#allocation15_spill]] (!%p523_p9)  ;;  %v4786_v37 = vld [vmem:[%s6292_s6] ss:$12 sps:$4 sm:$0xff] (!%p523_p9)   ;;  %v4787_v38 = vld [vmem:[%s6292_s6 + $0x8] ss:$12 sps:$4 sm:$0xff] (!%p523_p9)   ;;  %s6315_s23 = smov (!%p523_p9), 32  }
  0x1b   : > { %v587_v29 = vand.u32 (!%p523_p9), 127, %v586_v28  ;;  %v4788_v39 = vld [vmem:[%s6292_s6 + $0x1c] ss:$12 sps:$4 sm:$0xff] (!%p523_p9)   ;;  %890 = vmatprep.subr.bf16.mxu1 (!%p523_p9), %v4784_v36  ;;  %v4791_v40 = vld [vmem:[%s6292_s6 + $0x20] ss:$12 sps:$4 sm:$0xff] (!%p523_p9)   ;;  %vm1238_vm3 = vcmask (!%p523_p9), 1043456  }
  0x1c   : > { %891 = vmatpush1.bf16.msra.mxu1 (!%p523_p9), %v4786_v37  ;;  %v4790_v41 = vld [vmem:[%s6292_s6 + $0x18] ss:$12 sps:$4 sm:$0xff] (!%p523_p9)   ;;  %v4792_v42 = vld [vmem:[%s6292_s6 + $0x34] ss:$12 sps:$4 sm:$0xff] (!%p523_p9)   ;;  %v4794_v47 = vld [vmem:[%s6292_s6 + $0x30] ss:$12 sps:$4 sm:$0xff] (!%p523_p9)  }
  0x1d   : > { %892 = vmatprep.subr.bf16.mxu1 (!%p523_p9), %v4788_v39  ;;  %v4795_v48 = vld [vmem:[%s6292_s6 + $0x38] ss:$12 sps:$4 sm:$0xff] (!%p523_p9)   ;;  %v4798_v50 = vld [vmem:[%s6292_s6 + $0x48] ss:$12 sps:$4 sm:$0xff] (!%p523_p9)   ;;  %v4799_v51 = vld [vmem:[%s6292_s6 + $0x50] ss:$12 sps:$4 sm:$0xff] (!%p523_p9)  }
  0x1e   : > { %v593_v0 = vld [vmem:[%s6333_s26] sm:$0xff] (!%p523_p9)  ;;  %v594_v1 = vld [vmem:[%s6333_s26 + $0x8] sm:$0xff] (!%p523_p9)  ;;  %v595_v2 = vld [vmem:[%s6333_s26 + $0x10] sm:$0xff] (!%p523_p9)  ;;  %s6336_s19 = sld [smem:[#allocation13_spill]] (!%p523_p9)  ;;  %vm1186_vm4 = vcmask (!%p523_p9), 64512   ;;  %vm1433_vm5 = vcmask (!%p523_p9), 523264  }
  0x1f   : > { %v4713_v5 = vpack.c.bf16 (!%p523_p9), %v594_v1, %v593_v0  ;;  %v596_v6 = vld [vmem:[%s6333_s26 + $0x18] sm:$0xff] (!%p523_p9)  ;;  %v597_v8 = vld [vmem:[%s6333_s26 + $0x20] sm:$0xff] (!%p523_p9)  ;;  %v598_v9 = vld [vmem:[%s6333_s26 + $0x28] sm:$0xff] (!%p523_p9)  ;;  %vm1435_vm6 = vcmask (!%p523_p9), 785408   ;;  %s6338_s22 = smov (!%p523_p9), 32   ;;  %s6340_s29 = sld [smem:[#allocation16_spill]] (!%p523_p9) }
  0x20   : > { %s5313_s24 = scalar_select %p577_p10, %s5271_s0, 1  ;;  %v4716_v7 = vpack.c.bf16 %v596_v6, %v595_v2  ;;  %v599_v11 = vld [vmem:[%s6333_s26 + $0x30] sm:$0xff]  ;;  %v4719_v12 = vpack.c.bf16 %v598_v9, %v597_v8  ;;  %v600_v13 = vld [vmem:[%s6333_s26 + $0x38] sm:$0xff]  ;;  %v601_v15 = vld [vmem:[%s6333_s26 + $0x40] sm:$0xff]  ;;  %893 = vmatpush1.bf16.msra.mxu1 %v4790_v41 }
  0x21   : > { %4714 = vmatpush3.bf16.msra.mxu0 %v4713_v5  ;;  %v602_v16 = vld [vmem:[%s6333_s26 + $0x48] sm:$0xff]  ;;  %v4722_v17 = vpack.c.bf16 %v600_v13, %v599_v11  ;;  %v603_v18 = vld [vmem:[%s6333_s26 + $0x50] sm:$0xff]  ;;  %v604_v19 = vld [vmem:[%s6333_s26 + $0x58] sm:$0xff]  ;;  %894 = vmatprep.subr.bf16.mxu1 %v4792_v42  ;;  %v5461_v11 = vshrl.u32 %v586_v28, 7 }
  0x22   : > { %s3949_s25 = sshll.u32 %s5313_s24, 3  ;;  %4715 = vmatprep.subr.bf16.mxu0 %v5147_v4  ;;  %v4725_v20 = vpack.c.bf16 %v602_v16, %v601_v15  ;;  %v605_v21 = vld [vmem:[%s6333_s26 + $0x60] sm:$0xff]  ;;  %v606_v22 = vld [vmem:[%s6333_s26 + $0x68] sm:$0xff]  ;;  %v4728_v23 = vpack.c.bf16 %v604_v19, %v603_v18  ;;  %v607_v24 = vld [vmem:[%s6333_s26 + $0x70] sm:$0xff] }
  0x23   : > { %s580_s27 = scalar_lea.vmem %s6334_s1, %s3949_s25  ;;  %v608_v25 = vld [vmem:[%s6333_s26 + $0x78] sm:$0xff]  ;;  %v4731_v26 = vpack.c.bf16 %v606_v22, %v605_v21  ;;  %v609_v32 = vld [vmem:[%s6335_s3] sm:$0xff]  ;;  %v4803_v54 = vld [vmem:[%s6292_s6 + $0x68] ss:$12 sps:$4 sm:$0xff]   ;;  %v5470_v15 = vsub.s32 1, %v5461_v11  ;;  %s5152_s25 = smov 96  }
  0x24   : > { %v585_v10 = vld [vmem:[%s580_s27] sm:$0xff]  ;;  %v4734_v27 = vpack.c.bf16 %v608_v25, %v607_v24  ;;  %895 = vmatpush1.bf16.msra.mxu1 %v4794_v47  ;;  %v4796_v49 = vld [vmem:[%s6292_s6 + $0x4c] ss:$12 sps:$4 sm:$0xff]   ;;  %v4804_v55 = vld [vmem:[%s6292_s6 + $0x7c] ss:$12 sps:$4 sm:$0xff]   ;;  %s6317_s27 = smov 64   ;;  %s583_s2 = scalar_lea.vmem %s6336_s19, %s5313_s24 }
  0x25   : > { %589 = vperm.xlu0 %4783, %v585_v10   ;;  %4717 = vmatpush3.bf16.msra.mxu0 %v4716_v7  ;;  %v4800_v52 = vld [vmem:[%s6292_s6 + $0x64] ss:$12 sps:$4 sm:$0xff]   ;;  %v4802_v53 = vld [vmem:[%s6292_s6 + $0x60] ss:$12 sps:$4 sm:$0xff]   ;;  %v4814_v62 = vld [vmem:[%s6292_s6 + $0xa8] ss:$12 sps:$4 sm:$0xff]  }
  0x26   : > { %4718 = vmatprep.subr.bf16.mxu0 %v5147_v4  ;;  %896 = vmatprep.subr.bf16.mxu1 %v4796_v49  ;;  %v4806_v56 = vld [vmem:[%s6292_s6 + $0x78] ss:$12 sps:$4 sm:$0xff]   ;;  %v4807_v57 = vld [vmem:[%s6292_s6 + $0x80] ss:$12 sps:$4 sm:$0xff]   ;;  %v4810_v59 = vld [vmem:[%s6292_s6 + $0x90] ss:$12 sps:$4 sm:$0xff]  }
  0x27   : > { %v4808_v58 = vld [vmem:[%s6292_s6 + $0x94] ss:$12 sps:$4 sm:$0xff]   ;;  %v4811_v60 = vld [vmem:[%s6292_s6 + $0x98] ss:$12 sps:$4 sm:$0xff]   ;;  %v4815_v63 = vld [vmem:[%s6292_s6 + $0xb0] ss:$12 sps:$4 sm:$0xff]  }
  0x28   : > { %897 = vmatpush1.bf16.msra.mxu1 %v4798_v50  ;;  %v4812_v61 = vld [vmem:[%s6292_s6 + $0xac] ss:$12 sps:$4 sm:$0xff]   ;;  %v3951_v5 = vld [vmem:[%s6290_s4] ss:$0 sm:$0xff]  ;;  %s6337_s1 = smov 64   ;;  %s575_s19 = sand.u32 1, %s5136_s28  }
  0x29   : > { %4720 = vmatpush3.bf16.msra.mxu0 %v4719_v12  ;;  %898 = vmatprep.subr.bf16.mxu1 %v4800_v52  ;;  %v3952_v7 = vld [vmem:[%s6291_s5] ss:$0 sm:$0xff]  ;;  %v5464_v12 = vsub.s32 0, %v5461_v11  ;;  %s3869_s18 = scalar_lea.sflag [#allocation3], %s575_s19 }
  0x2a   : > { %4721 = vmatprep.subr.bf16.mxu0 %v5147_v4  ;;  %v744_v13 = vld [vmem:[%s6293_s7] sm:$0x7] }
  0x2b   : > { %v750_v16 = vrot.slane %v744_v13, %v5464_v12 }
  0x2c   : > { %899 = vmatpush1.bf16.msra.mxu1 %v4802_v53 }
  0x2d   : > { %4723 = vmatpush3.bf16.msra.mxu0 %v4722_v17  ;;  %900 = vmatprep.subr.bf16.mxu1 %v4804_v55  ;;  %v754_v17 = vrot.slane %v744_v13, %v5470_v15 }
  0x2e   : > { %4724 = vmatprep.subr.bf16.mxu0 %v5147_v4 }
  0x30   : > { %901 = vmatpush1.bf16.msra.mxu1 %v4806_v56 }
  0x31   : > { %4726 = vmatpush3.bf16.msra.mxu0 %v4725_v20  ;;  %902 = vmatprep.subr.bf16.mxu1 %v4808_v58 }
  0x32   : > { %4727 = vmatprep.subr.bf16.mxu0 %v5147_v4 }
  0x34   : > { %903 = vmatpush1.bf16.msra.mxu1 %v4810_v59 }
  0x35   : > { %4729 = vmatpush3.bf16.msra.mxu0 %v4728_v23  ;;  %904 = vmatprep.subr.bf16.mxu1 %v4812_v61 }
  0x36   : > { %4730 = vmatprep.subr.bf16.mxu0 %v5147_v4 }
  0x38   : > { %905 = vmatpush1.bf16.msra.mxu1 %v4814_v62 }
  0x39   : > { %4732 = vmatpush3.bf16.msra.mxu0 %v4731_v26  ;;  %4556 = vmatprep.subr.bf16.mxu1 %v5149_v14 }
  0x3a   : > { %4733 = vmatprep.subr.bf16.mxu0 %v5147_v4 }
  0x3d   : > { %4735 = vmatpush3.bf16.msra.mxu0 %v4734_v27 }
  0x3e   : > { %4536 = vmatprep.subr.bf16.mxu0 %v5149_v14 }
  0xa4   : > { %v590_v30 = vpop.permute.xlu0 %589 }
  0xa5   : > { %vm591_vm1 = vcmp.eq.s32.totalorder %v587_v29, %v590_v30 }
  0xa6   : > { %4534 = vmatmul.mubr.msk.f32.vlgmr.msra.gmra.mrb[0].mxu0 %vm591_vm1, %v5150_v31 }
  0xa7   : > { %4552 = vmatprep.mubr.msk.bf16.mxu0 %vm5148_vm0, %v5149_v14  ;;  %4537 = vmatpush3.bf16.msra.mxu0 %v4787_v38 }
  0xa8   : > { %4538 = vmatprep.subr.bf16.mxu0 %v5149_v14 }
  0xab   : > { %4539 = vmatpush3.bf16.msra.mxu0 %v4791_v40 }
  0xac   : > { %4540 = vmatprep.subr.bf16.mxu0 %v5149_v14 }
  0xaf   : > { %4541 = vmatpush3.bf16.msra.mxu0 %v4795_v48 }
  0xb0   : > { %4542 = vmatprep.subr.bf16.mxu0 %v5149_v14 }
  0xb3   : > { %4543 = vmatpush3.bf16.msra.mxu0 %v4799_v51 }
  0xb4   : > { %4544 = vmatprep.subr.bf16.mxu0 %v5149_v14 }
  0xb7   : > { %4545 = vmatpush3.bf16.msra.mxu0 %v4803_v54 }
  0xb8   : > { %4546 = vmatprep.subr.bf16.mxu0 %v5149_v14 }
  0xbb   : > { %4547 = vmatpush3.bf16.msra.mxu0 %v4807_v57 }
  0xbc   : > { %4548 = vmatprep.subr.bf16.mxu0 %v5149_v14 }
  0xbf   : > { %4549 = vmatpush3.bf16.msra.mxu0 %v4811_v60 }
  0xc0   : > { %4550 = vmatprep.subr.bf16.mxu0 %v5149_v14 }
  0xc3   : > { %4551 = vmatpush3.bf16.msra.mxu0 %v4815_v63 }
  0xc4   : > { %4604 = vmatprep.subr.bf16.mxu0 %v5149_v14 }
 0x179   : > { %v676_v33 = vpop.f32.mrb[0].mxu0 }
 0x17a   : > { %v677_v34 = vadd.f32 %v676_v33, %v609_v32  ;;  %v4535_v35 = vpop.f32.mrb[1].mxu0 }
 0x17b   : > { %v5488_v35 = vsub.s32 2, %v5461_v11 }
 0x17c   : > { %682 = vadd.xlane.f32.xlu0 %v677_v34 }
 0x17d   : > { %v758_v38 = vrot.slane %v744_v13, %v5488_v35 }
 0x209   : > { %v683_v43 = vpop.xlane.xlu0 %682 }
 0x20a   : > { %v685_v44 = vmul.f32 0.0078125, %v683_v43 }
 0x20c   : > { %v686_v45 = vsub.f32 %v677_v34, %v685_v44 }
 0x20e   : > { %v687_v46 = vmul.f32 %v686_v45, %v686_v45 }
 0x210   : > { %688 = vadd.xlane.f32.xlu1 %v687_v46 }
 0x29d   : > { %v689_v0 = vpop.xlane.xlu1 %688 }
 0x29e   : > { %v690_v1 = vmul.f32 0.0078125, %v689_v0 }
 0x2a0   : > { %v691_v2 = vadd.f32 1e-12, %v690_v1 }
 0x2a2   : > { %5024 = vrsqrt.f32 %v691_v2 }
 0x2ac   : > { %v5025_v4 = vpop.eup %5024 }
 0x2ad   : > { %v693_v6 = vmul.f32 %v5025_v4, %v686_v45  ;;  %v708_v45 = vld [vmem:[%s583_s2] sm:$0x1]  ;;  %s4325_s2 = sshll.u32 %s5271_s0, 4  ;;  %s5154_s0 = smov [#allocation2]  }
 0x2ae   : > { %v709_v46 = vcvt.s32.f32 %v708_v45 }
 0x2af   : > { %v700_v8 = vmul.f32 %v3951_v5, %v693_v6 }
 0x2b0   : > { %v710_v47 = vsub.f32 1.0, %v709_v46 }
 0x2b1   : > { %v5452_v9 = vadd.f32 %v3952_v7, %v700_v8 }
 0x2b2   : > { %v711_v48 = vmul.f32 -10000.0, %v710_v47 }
 0x2b3   : > { %v745_v10 = vpack.c.bf16 %v5452_v9, %v5452_v9 }
 0x2b4   : > { %v5514_v49 = vrot.slane %v711_v48, %v5464_v12 }
 0x2b5   : > { %923 = vmatmul.mubr.bf16.vlgmr.msra.gmra.mrb[0].mxu1 %v745_v10  ;;  %4553 = vmatmul.mubr.bf16.vlgmr.msra.gmra.mrb[4].mxu0 %v745_v10 }
 0x2b6   : > { %4558 = vmatprep.mubr.msk.bf16.mxu1 %vm5148_vm0, %v5149_v14  ;;  %4620 = vmatprep.mubr.msk.bf16.mxu0 %vm5148_vm0, %v5149_v14 }
 0x388   : > { %v924_v18 = vpop.f32.mrb[0].mxu1  ;;  %v965_v19 = vpop.f32.mrb[4].mxu0 }
 0x389   : > { %v925_v20 = vadd.f32 %v924_v18, %v750_v16  ;;  %v926_v21 = vpop.f32.mrb[1].mxu1  ;;  %v4554_v22 = vpop.f32.mrb[5].mxu0  ;;  %v966_v40 = vadd.f32 %v965_v19, %v758_v38 }
 0x38a   : > { %v927_v23 = vadd.f32 %v926_v21, %v754_v17  ;;  %v928_v24 = vpop.f32.mrb[2].mxu1  ;;  %v968_v25 = vpop.f32.mrb[6].mxu0 }
 0x38b   : > { %v971_v26 = vpack.c.bf16 %v925_v20, %v925_v20  ;;  %v929_v27 = vpop.f32.mrb[3].mxu1  ;;  %v4555_v28 = vpop.f32.mrb[7].mxu0  ;;  %v5501_v42 = vpack.c.bf16 %v966_v40, %v966_v40 }
 0x38c   : > { %v972_v29 = vpack.c.bf16 %v927_v23, %v927_v23 }
 0x38d   : > { %979 = vrot.lane.b32.xlu0 %v971_v26, %s6315_s23  ;;  %v1240_v44 = vsel %vm1238_vm3, %v5501_v42, 0 }
 0x38e   : > { %982 = vrot.lane.b32.xlu1 %v972_v29, %s5152_s25  ;;  %v1006_v30 = vsel %vm1001_vm2, %v972_v29, 0 }
 0x38f   : > { %4557 = vmatpush3.bf16.xpose.msra.mxu1 %v1006_v30 }
 0x390   : > { %4562 = vmatprep.subr.bf16.mxu1 %v5149_v14 }
 0x392   : > { %975 = vrot.lane.b32.xlu1 %v971_v26, %s5152_s25 }
 0x396   : > { %984 = vrot.lane.b32.xlu1 %v972_v29, %s6317_s27  ;;  %4559 = vmatmul.mubr.msk.bf16.vlgmr.msra.gmra.mrb[4].mxu1 %vm1001_vm2, %v971_v26 }
 0x397   : > { %4564 = vmatprep.mubr.msk.bf16.mxu1 %vm5148_vm0, %v5149_v14 }
 0x39a   : > { %977 = vrot.lane.b32.xlu1 %v971_v26, %s6317_s27 }
 0x39e   : > { %986 = vrot.lane.b32.xlu1 %v972_v29, %s6315_s23 }
 0x3ff   : > { %v980_v43 = vpop.permute.xlu0 %979 }
 0x400   : > { %v983_v31 = vpop.permute.xlu1 %982 }
 0x401   : > { %v1052_v32 = vsel %vm1001_vm2, %v983_v31, 0 }
 0x402   : > { %4563 = vmatpush3.bf16.xpose.msra.mxu1 %v1052_v32 }
 0x403   : > { %4568 = vmatprep.subr.bf16.mxu1 %v5149_v14 }
 0x404   : > { %v976_v33 = vpop.permute.xlu1 %975 }
 0x408   : > { %v985_v34 = vpop.permute.xlu1 %984 }
 0x409   : > { %v1098_v36 = vsel %vm1001_vm2, %v985_v34, 0  ;;  %4565 = vmatmul.mubr.msk.bf16.vlgmr.msra.gmra.mrb[8].mxu1 %vm1001_vm2, %v976_v33 }
 0x40a   : > { %4569 = vmatpush3.bf16.xpose.msra.mxu1 %v1098_v36  ;;  %4570 = vmatprep.mubr.msk.bf16.mxu1 %vm5148_vm0, %v5149_v14 }
 0x40b   : > { %4574 = vmatprep.subr.bf16.mxu1 %v5149_v14 }
 0x40c   : > { %v978_v37 = vpop.permute.xlu1 %977 }
 0x410   : > { %v987_v39 = vpop.permute.xlu1 %986 }
 0x411   : > { %v1144_v41 = vsel %vm1001_vm2, %v987_v39, 0  ;;  %4571 = vmatmul.mubr.msk.bf16.vlgmr.msra.gmra.mrb[12].mxu1 %vm1001_vm2, %v978_v37 }
 0x412   : > { %4575 = vmatpush3.bf16.xpose.msra.mxu1 %v1144_v41  ;;  %4576 = vmatprep.mubr.msk.bf16.mxu1 %vm5148_vm0, %v5149_v14 }
 0x413   : > { %4580 = vmatprep.subr.bf16.mxu1 %v5149_v14 }
 0x419   : > { %4577 = vmatmul.mubr.msk.bf16.vlgmr.msra.gmra.mrb[16].mxu1 %vm1001_vm2, %v980_v43 }
 0x41a   : > { %4581 = vmatpush3.bf16.msra.mxu1 %v1240_v44  ;;  %4582 = vmatprep.mubr.msk.bf16.mxu1 %vm5148_vm0, %v5149_v14 }
 0x41b   : > { %4586 = vmatprep.subr.bf16.mxu1 %v5149_v14 }
 0x469   : > { %v1042_v50 = vpop.f32.mrb[4].mxu1 }
 0x46a   : > { %v1043_v51 = vadd.f32 %v1042_v50, %v5514_v49  ;;  %v4560_v52 = vpop.f32.mrb[5].mxu1 }
 0x46b   : > { %v1045_v53 = vpop.f32.mrb[6].mxu1 }
 0x46c   : > { %v4561_v54 = vpop.f32.mrb[7].mxu1  ;;  %v1187_v55 = vsel %vm1186_vm4, %v1043_v51, -inf }
 0x46d   : > { %1188 = vmax.xlane.f32.xlu1 %v1187_v55 }
 0x4dc   : > { %v1088_v56 = vpop.f32.mrb[8].mxu1 }
 0x4dd   : > { %v1089_v57 = vadd.f32 %v1088_v56, %v5514_v49  ;;  %v4566_v58 = vpop.f32.mrb[9].mxu1 }
 0x4de   : > { %v1091_v59 = vpop.f32.mrb[10].mxu1 }
 0x4df   : > { %v4567_v60 = vpop.f32.mrb[11].mxu1  ;;  %v1190_v61 = vsel %vm1186_vm4, %v1089_v57, -inf }
 0x4e0   : > { %1191 = vmax.xlane.f32.xlu0 %v1190_v61 }
 0x4e4   : > { %v1134_v62 = vpop.f32.mrb[12].mxu1 }
 0x4e5   : > { %v1135_v63 = vadd.f32 %v1134_v62, %v5514_v49  ;;  %v4572_v0 = vpop.f32.mrb[13].mxu1 }
 0x4e6   : > { %v1137_v1 = vpop.f32.mrb[14].mxu1  ;;  %v4816_v0 = vld [vmem:[%s6294_s8] sm:$0xff]  }
 0x4e7   : > { %v4573_v2 = vpop.f32.mrb[15].mxu1  ;;  %v1193_v4 = vsel %vm1186_vm4, %v1135_v63, -inf  ;;  %4605 = vmatpush3.bf16.msra.mxu0 %v4816_v0  ;;  %v4817_v1 = vld [vmem:[%s6294_s8 + $0x8] sm:$0xff]  }
 0x4e8   : > { %1194 = vmax.xlane.f32.xlu1 %v1193_v4  ;;  %4606 = vmatprep.subr.bf16.mxu0 %v5149_v14  ;;  %v4851_v0 = vld [vmem:[%s6298_s12 + $0x88] ss:$16 sps:$4 sm:$0xff]  }
 0x4eb   : > { %4607 = vmatpush3.bf16.msra.mxu0 %v4817_v1  ;;  %v4856_v1 = vld [vmem:[%s6298_s12 + $0xa4] ss:$16 sps:$4 sm:$0xff]  }
 0x4ec   : > { %v1180_v5 = vpop.f32.mrb[16].mxu1  ;;  %4608 = vmatprep.subr.bf16.mxu0 %v5149_v14 }
 0x4ed   : > { %v1181_v6 = vadd.f32 %v1180_v5, %v5514_v49  ;;  %v4578_v7 = vpop.f32.mrb[17].mxu1 }
 0x4ee   : > { %v1183_v8 = vpop.f32.mrb[18].mxu1 }
 0x4ef   : > { %v4579_v10 = vpop.f32.mrb[19].mxu1  ;;  %v1196_v13 = vsel %vm1186_vm4, %v1181_v6, -inf  ;;  %v4819_v8 = vld [vmem:[%s6294_s8 + $0x18] sm:$0xff]  }
 0x4f0   : > { %1197 = vmax.xlane.f32.xlu1 %v1196_v13 }
 0x4fa   : > { %v1189_v16 = vpop.xlane.xlu1 %1188 }
 0x4fb   : > { %v1199_v17 = vsub.f32 %v1043_v51, %v1189_v16 }
 0x4fd   : > { %v1203_v18 = vmul.f32 1.442695, %v1199_v17  ;;  %v4820_v17 = vld [vmem:[%s6294_s8 + $0x20] sm:$0xff]  }
 0x4ff   : > { %5026 = vpow2.f32 %v1203_v18 }
 0x509   : > { %v5027_v19 = vpop.eup %5026 }
 0x50a   : > { %v1211_v20 = vsel %vm1186_vm4, %v5027_v19, 0.0 }
 0x50b   : > { %1212 = vadd.xlane.f32.xlu1 %v1211_v20  ;;  %v4822_v20 = vld [vmem:[%s6294_s8 + $0x30] sm:$0xff]  }
 0x56d   : > { %v1192_v21 = vpop.xlane.xlu0 %1191 }
 0x56e   : > { %v1200_v22 = vsub.f32 %v1089_v57, %v1192_v21  ;;  %v4823_v21 = vld [vmem:[%s6294_s8 + $0x38] sm:$0xff]  }
 0x570   : > { %v1205_v23 = vmul.f32 1.442695, %v1200_v22 }
 0x572   : > { %5028 = vpow2.f32 %v1205_v23 }
 0x575   : > { %v1195_v24 = vpop.xlane.xlu1 %1194 }
 0x576   : > { %v1201_v25 = vsub.f32 %v1135_v63, %v1195_v24 }
 0x578   : > { %v1207_v26 = vmul.f32 1.442695, %v1201_v25 }
 0x57a   : > { %5030 = vpow2.f32 %v1207_v26 }
 0x57c   : > { %v5029_v27 = vpop.eup %5028 }
 0x57d   : > { %v1214_v28 = vsel %vm1186_vm4, %v5029_v27, 0.0  ;;  %v1198_v31 = vpop.xlane.xlu1 %1197 }
 0x57e   : > { %1215 = vadd.xlane.f32.xlu1 %v1214_v28  ;;  %v1202_v33 = vsub.f32 %v1181_v6, %v1198_v31  ;;  %v4818_v6 = vld [vmem:[%s6294_s8 + $0x10] sm:$0xff]  }
 0x57f   : > { %4609 = vmatpush3.bf16.msra.mxu0 %v4818_v6  ;;  %v4862_v6 = vld [vmem:[%s6298_s12 + $0xc4] ss:$16 sps:$4 sm:$0xff]  }
 0x580   : > { %v1209_v34 = vmul.f32 1.442695, %v1202_v33  ;;  %4610 = vmatprep.subr.bf16.mxu0 %v5149_v14  ;;  %v3985_v33 = vld [vmem:[%s6295_s9] ss:$0 sm:$0xff] }
 0x583   : > { %4611 = vmatpush3.bf16.msra.mxu0 %v4819_v8  ;;  %v4860_v8 = vld [vmem:[%s6298_s12 + $0xc0] ss:$16 sps:$4 sm:$0xff]  }
 0x584   : > { %v5031_v29 = vpop.eup %5030  ;;  %4612 = vmatprep.subr.bf16.mxu0 %v5149_v14 }
 0x585   : > { %v1217_v30 = vsel %vm1186_vm4, %v5031_v29, 0.0 }
 0x586   : > { %1218 = vadd.xlane.f32.xlu0 %v1217_v30 }
 0x587   : > { %4613 = vmatpush3.bf16.msra.mxu0 %v4820_v17  ;;  %v4869_v17 = vld [vmem:[%s6298_s12 + $0xe8] ss:$16 sps:$4 sm:$0xff]  }
 0x588   : > { %4614 = vmatprep.subr.bf16.mxu0 %v5149_v14 }
 0x58f   : > { %991 = vrot.lane.b32.xlu1 %v5501_v42, %s6317_s27 }
 0x598   : > { %v1213_v32 = vpop.xlane.xlu1 %1212 }
 0x599   : > { %5032 = vrcp.f32 %v1213_v32 }
 0x59a   : > { %5034 = vpow2.f32 %v1209_v34 }
 0x59c   : > { %989 = vrot.lane.b32.xlu0 %v5501_v42, %s5152_s25 }
 0x5a3   : > { %v5033_v36 = vpop.eup %5032 }
 0x5a4   : > { %v1227_v37 = vmul.f32 %v5033_v36, %v5027_v19  ;;  %v5035_v39 = vpop.eup %5034  ;;  %v4821_v19 = vld [vmem:[%s6294_s8 + $0x28] sm:$0xff]  }
 0x5a5   : > { %v1220_v40 = vsel %vm1186_vm4, %v5035_v39, 0.0  ;;  %4615 = vmatpush3.bf16.msra.mxu0 %v4821_v19 }
 0x5a6   : > { %v1231_v38 = vpack.c.bf16 %v1227_v37, %v1227_v37  ;;  %4616 = vmatprep.subr.bf16.mxu0 %v5149_v14 }
 0x5a8   : > { %4583 = vmatmul.mubr.msk.bf16.vlgmr.msra.gmra.mrb[20].mxu1 %vm1186_vm4, %v1231_v38 }
 0x5a9   : > { %4588 = vmatprep.mubr.msk.bf16.mxu1 %vm5148_vm0, %v5149_v14  ;;  %4617 = vmatpush3.bf16.msra.mxu0 %v4822_v20 }
 0x5aa   : > { %4618 = vmatprep.subr.bf16.mxu0 %v5149_v14 }
 0x5ad   : > { %4619 = vmatpush3.bf16.msra.mxu0 %v4823_v21 }
 0x5b3   : > { %1221 = vadd.xlane.f32.xlu1 %v1220_v40 }
 0x5c4   : > { %993 = vrot.lane.b32.xlu1 %v5501_v42, %s6315_s23 }
 0x60b   : > { %v1216_v41 = vpop.xlane.xlu1 %1215 }
 0x60c   : > { %5036 = vrcp.f32 %v1216_v41  ;;  %v4824_v41 = vld [vmem:[%s6298_s12] ss:$16 sps:$4 sm:$0xff]  }
 0x60f   : > { %v992_v48 = vpop.permute.xlu1 %991 }
 0x610   : > { %v1332_v51 = vsel %vm1238_vm3, %v992_v48, 0  ;;  %v4833_v48 = vld [vmem:[%s6298_s12 + $0x28] ss:$16 sps:$4 sm:$0xff]  }
 0x613   : > { %v1219_v43 = vpop.xlane.xlu0 %1218 }
 0x614   : > { %5038 = vrcp.f32 %v1219_v43  ;;  %v4826_v43 = vld [vmem:[%s6298_s12 + $0x4] ss:$16 sps:$4 sm:$0xff]  }
 0x616   : > { %v5037_v44 = vpop.eup %5036 }
 0x617   : > { %v1228_v45 = vmul.f32 %v5037_v44, %v5029_v27  ;;  %v990_v46 = vpop.permute.xlu0 %989  ;;  %v4827_v44 = vld [vmem:[%s6298_s12 + $0x8] ss:$16 sps:$4 sm:$0xff]  }
 0x618   : > { %v1286_v47 = vsel %vm1238_vm3, %v990_v46, 0  ;;  %v4835_v46 = vld [vmem:[%s6298_s12 + $0x2c] ss:$16 sps:$4 sm:$0xff]  }
 0x619   : > { %4587 = vmatpush3.bf16.msra.mxu1 %v1286_v47  ;;  %v1232_v50 = vpack.c.bf16 %v1228_v45, %v1228_v45  ;;  %v4829_v45 = vld [vmem:[%s6298_s12 + $0xc] ss:$16 sps:$4 sm:$0xff]   ;;  %v4830_v47 = vld [vmem:[%s6298_s12 + $0x20] ss:$16 sps:$4 sm:$0xff]  }
 0x61a   : > { %4592 = vmatprep.subr.bf16.mxu1 %v5149_v14  ;;  %1833 = vmatprep.subr.bf16.mxu0 %v4829_v45  ;;  %v4886_v45 = vld [vmem:[%s6300_s14 + $0x18] sm:$0xff]  }
 0x61c   : > { %4589 = vmatmul.mubr.msk.bf16.vlgmr.msra.gmra.mrb[24].mxu1 %vm1186_vm4, %v1232_v50  ;;  %v4838_v50 = vld [vmem:[%s6298_s12 + $0x44] ss:$16 sps:$4 sm:$0xff]  }
 0x61d   : > { %4593 = vmatpush3.bf16.msra.mxu1 %v1332_v51  ;;  %4594 = vmatprep.mubr.msk.bf16.mxu1 %vm5148_vm0, %v5149_v14  ;;  %v4841_v51 = vld [vmem:[%s6298_s12 + $0x4c] ss:$16 sps:$4 sm:$0xff]  }
 0x61e   : > { %v5039_v42 = vpop.eup %5038  ;;  %4598 = vmatprep.subr.bf16.mxu1 %v5149_v14 }
 0x61f   : > { %v1229_v52 = vmul.f32 %v5039_v42, %v5031_v29  ;;  %v4836_v42 = vld [vmem:[%s6298_s12 + $0x40] ss:$16 sps:$4 sm:$0xff]  }
 0x621   : > { %v1233_v53 = vpack.c.bf16 %v1229_v52, %v1229_v52  ;;  %v4839_v52 = vld [vmem:[%s6298_s12 + $0x48] ss:$16 sps:$4 sm:$0xff]  }
 0x624   : > { %4595 = vmatmul.mubr.msk.bf16.vlgmr.msra.gmra.mrb[28].mxu1 %vm1186_vm4, %v1233_v53 }
 0x625   : > { %4600 = vmatprep.mubr.msk.bf16.mxu1 %vm5148_vm0, %v5149_v14 }
 0x640   : > { %v1222_v54 = vpop.xlane.xlu1 %1221 }
 0x641   : > { %5040 = vrcp.f32 %v1222_v54 }
 0x644   : > { %v994_v55 = vpop.permute.xlu1 %993 }
 0x645   : > { %v1378_v56 = vsel %vm1238_vm3, %v994_v55, 0 }
 0x646   : > { %4599 = vmatpush3.bf16.msra.mxu1 %v1378_v56 }
 0x647   : > { %1792 = vmatprep.subr.bf16.mxu1 %v4826_v43  ;;  %v4884_v43 = vld [vmem:[%s6300_s14 + $0x58] sm:$0xff]  }
 0x64b   : > { %v5041_v57 = vpop.eup %5040 }
 0x64c   : > { %v1230_v58 = vmul.f32 %v5041_v57, %v5035_v39  ;;  %v4844_v57 = vld [vmem:[%s6298_s12 + $0x64] ss:$16 sps:$4 sm:$0xff]  }
 0x64e   : > { %v1234_v59 = vpack.c.bf16 %v1230_v58, %v1230_v58  ;;  %v4847_v58 = vld [vmem:[%s6298_s12 + $0x6c] ss:$16 sps:$4 sm:$0xff]  }
 0x650   : > { %4601 = vmatmul.mubr.msk.bf16.vlgmr.msra.gmra.mrb[32].mxu1 %vm1186_vm4, %v1234_v59  ;;  %v4842_v59 = vld [vmem:[%s6298_s12 + $0x60] ss:$16 sps:$4 sm:$0xff]  }
 0x651   : > { %1824 = vmatprep.mubr.bf16.mxu1 %v5146_v3  ;;  %1793 = vmatpush1.bf16.msra.mxu1 %v4824_v41  ;;  %v4883_v41 = vld [vmem:[%s6300_s14 + $0x90] sm:$0xff]  }
 0x67b   : > { %v1276_v60 = vpop.f32.mrb[20].mxu1 }
 0x67c   : > { %v4584_v61 = vpop.f32.mrb[21].mxu1 }
 0x67d   : > { %v1279_v62 = vpop.f32.mrb[22].mxu1  ;;  %v4850_v61 = vld [vmem:[%s6298_s12 + $0x84] ss:$16 sps:$4 sm:$0xff]  }
 0x67e   : > { %v4585_v63 = vpop.f32.mrb[23].mxu1  ;;  %v4853_v62 = vld [vmem:[%s6298_s12 + $0x8c] ss:$16 sps:$4 sm:$0xff]  }
 0x67f   : > { %v4848_v63 = vld [vmem:[%s6298_s12 + $0x80] ss:$16 sps:$4 sm:$0xff]  }
 0x6ef   : > { %v1322_v2 = vpop.f32.mrb[24].mxu1 }
 0x6f0   : > { %1421 = vrot.lane.b32.xlu0 %v1322_v2, %s6315_s23  ;;  %v4590_v4 = vpop.f32.mrb[25].mxu1  ;;  %v4859_v2 = vld [vmem:[%s6298_s12 + $0xac] ss:$16 sps:$4 sm:$0xff]   ;;  %s6244_s23 = scalar_lea.hbm %s6340_s29, %s4325_s2 }
 0x6f1   : > { %v1325_v5 = vpop.f32.mrb[26].mxu1  ;;  %v4854_v4 = vld [vmem:[%s6298_s12 + $0xa0] ss:$16 sps:$4 sm:$0xff]  }
 0x6f2   : > { %v4591_v7 = vpop.f32.mrb[27].mxu1  ;;  %v4857_v5 = vld [vmem:[%s6298_s12 + $0xa8] ss:$16 sps:$4 sm:$0xff]  }
 0x6f3   : > { %v4865_v7 = vld [vmem:[%s6298_s12 + $0xcc] ss:$16 sps:$4 sm:$0xff]  }
 0x6f7   : > { %v1368_v10 = vpop.f32.mrb[28].mxu1 }
 0x6f8   : > { %1425 = vrot.lane.b32.xlu1 %v1368_v10, %s6317_s27  ;;  %v4596_v13 = vpop.f32.mrb[29].mxu1  ;;  %v4863_v10 = vld [vmem:[%s6298_s12 + $0xc8] ss:$16 sps:$4 sm:$0xff]   ;;  %s5086_s27 = sshll.u32 %s5154_s0, 4  ;;  %s5087_s27 = int_to_ptr.vmem [resolvable:$false] %s5086_s27 }
 0x6f9   : > { %v1371_v16 = vpop.f32.mrb[30].mxu1  ;;  %v4868_v13 = vld [vmem:[%s6298_s12 + $0xe4] ss:$16 sps:$4 sm:$0xff]   ;;  %s5088_s3 = scalar_lea.vmem %s5087_s27, 32 }
 0x6fa   : > { %v4597_v18 = vpop.f32.mrb[31].mxu1  ;;  %v4866_v16 = vld [vmem:[%s6298_s12 + $0xe0] ss:$16 sps:$4 sm:$0xff]  }
 0x6fb   : > { %v4871_v18 = vld [vmem:[%s6298_s12 + $0xec] ss:$16 sps:$4 sm:$0xff]  }
 0x723   : > { %v1414_v22 = vpop.f32.mrb[32].mxu1 }
 0x724   : > { %1429 = vrot.lane.b32.xlu0 %v1414_v22, %s5152_s25  ;;  %v4602_v23 = vpop.f32.mrb[33].mxu1 }
 0x725   : > { %v1417_v24 = vpop.f32.mrb[34].mxu1  ;;  %v3994_v23 = vld [vmem:[%s6296_s10] ss:$0 sm:$0xff] }
 0x726   : > { %v4603_v25 = vpop.f32.mrb[35].mxu1 }
 0x727   : > { %v3995_v25 = vld [vmem:[%s6297_s11] ss:$0 sm:$0xff] }
 0x762   : > { %v1422_v26 = vpop.permute.xlu0 %1421 }
 0x763   : > { %v1432_v28 = vsel %vm1001_vm2, %v1276_v60, %v1422_v26  ;;  %v4845_v60 = vld [vmem:[%s6298_s12 + $0x68] ss:$16 sps:$4 sm:$0xff]  }
 0x76a   : > { %v1426_v27 = vpop.permute.xlu1 %1425 }
 0x76b   : > { %v1434_v29 = vsel %vm1433_vm5, %v1432_v28, %v1426_v27 }
 0x796   : > { %v1430_v30 = vpop.permute.xlu0 %1429 }
 0x797   : > { %v1436_v31 = vsel %vm1435_vm6, %v1434_v29, %v1430_v30  ;;  %v4872_v29 = vld [vmem:[%s6300_s14 + $0x40] sm:$0xff]  }
 0x798   : > { %v1454_v32 = vpack.c.bf16 %v1436_v31, %v1436_v31  ;;  %v4873_v30 = vld [vmem:[%s6300_s14 + $0xc0] sm:$0xff]  }
 0x799   : > { %v4874_v31 = vld [vmem:[%s6300_s14] sm:$0xff]  }
 0x79a   : > { %4621 = vmatmul.mubr.bf16.vlgmr.msra.gmra.mrb[8].mxu0 %v1454_v32  ;;  %v4875_v32 = vld [vmem:[%s6300_s14 + $0x80] sm:$0xff]  }
 0x79b   : > { %1865 = vmatprep.mubr.bf16.mxu0 %v5146_v3  ;;  %1834 = vmatpush1.bf16.msra.mxu0 %v4827_v44  ;;  %v4885_v44 = vld [vmem:[%s6300_s14 + $0xd8] sm:$0xff]  }
 0x79c   : > { %1835 = vmatprep.subr.bf16.mxu0 %v4835_v46  ;;  %v4888_v46 = vld [vmem:[%s6300_s14 + $0x60] sm:$0xff]  }
 0x79f   : > { %1836 = vmatpush1.bf16.msra.mxu0 %v4833_v48  ;;  %v4890_v48 = vld [vmem:[%s6300_s14 + $0x20] sm:$0xff]  }
 0x7a0   : > { %1837 = vmatprep.subr.bf16.mxu0 %v4841_v51  ;;  %v4892_v51 = vld [vmem:[%s6300_s14 + $0x68] sm:$0xff]  }
 0x7a3   : > { %1838 = vmatpush1.bf16.msra.mxu0 %v4839_v52  ;;  %v4894_v52 = vld [vmem:[%s6300_s14 + $0x28] sm:$0xff]  }
 0x7a4   : > { %1839 = vmatprep.subr.bf16.mxu0 %v4847_v58  ;;  %v4900_v58 = vld [vmem:[%s6300_s14 + $0x78] sm:$0xff]  }
 0x7a7   : > { %1840 = vmatpush1.bf16.msra.mxu0 %v4845_v60  ;;  %v4902_v60 = vld [vmem:[%s6300_s14 + $0x38] sm:$0xff]  }
 0x7a8   : > { %1841 = vmatprep.subr.bf16.mxu0 %v4853_v62  ;;  %v1609_v62 = vld [vmem:[%s6299_s13] sm:$0xf] }
 0x7ab   : > { %1842 = vmatpush1.bf16.msra.mxu0 %v4851_v0  ;;  %v1615_v0 = vrot.slane %v1609_v62, %v5464_v12 }
 0x7ac   : > { %1843 = vmatprep.subr.bf16.mxu0 %v4859_v2  ;;  %v1619_v2 = vrot.slane %v1609_v62, %v5470_v15 }
 0x7af   : > { %1844 = vmatpush1.bf16.msra.mxu0 %v4857_v5 }
 0x7b0   : > { %1845 = vmatprep.subr.bf16.mxu0 %v4865_v7 }
 0x7b3   : > { %1846 = vmatpush1.bf16.msra.mxu0 %v4863_v10 }
 0x7b4   : > { %1847 = vmatprep.subr.bf16.mxu0 %v4871_v18 }
 0x7b7   : > { %1848 = vmatpush1.bf16.msra.mxu0 %v4869_v17 }
 0x7b8   : > { %4401 = vmatprep.subr.bf16.mxu0 %v4873_v30 }
 0x86d   : > { %v1543_v34 = vpop.f32.mrb[8].mxu0 }
 0x86e   : > { %v1544_v36 = vadd.f32 %v3985_v33, %v1543_v34  ;;  %v4622_v37 = vpop.f32.mrb[9].mxu0  ;;  %v4876_v33 = vld [vmem:[%s6300_s14 + $0x48] sm:$0xff]  }
 0x86f   : > { %v1546_v38 = vpop.f32.mrb[10].mxu0  ;;  %v4877_v34 = vld [vmem:[%s6300_s14 + $0xc8] sm:$0xff]  }
 0x870   : > { %v4623_v39 = vpop.f32.mrb[11].mxu0  ;;  %v1549_v40 = vadd.f32 %v1544_v36, %v5452_v9  ;;  %v4832_v9 = vld [vmem:[%s6298_s12 + $0x24] ss:$16 sps:$4 sm:$0xff]   ;;  %v4878_v36 = vld [vmem:[%s6300_s14 + $0x8] sm:$0xff]  }
 0x871   : > { %1794 = vmatprep.subr.bf16.mxu1 %v4832_v9  ;;  %v4879_v37 = vld [vmem:[%s6300_s14 + $0x88] sm:$0xff]   ;;  %v4880_v38 = vld [vmem:[%s6300_s14 + $0x50] sm:$0xff]   ;;  %v4887_v9 = vld [vmem:[%s6300_s14 + $0x98] sm:$0xff]  }
 0x872   : > { %1552 = vadd.xlane.f32.xlu1 %v1549_v40  ;;  %1795 = vmatpush1.bf16.msra.mxu1 %v4830_v47  ;;  %v4881_v39 = vld [vmem:[%s6300_s14 + $0xd0] sm:$0xff]   ;;  %v4889_v47 = vld [vmem:[%s6300_s14 + $0xe0] sm:$0xff]  }
 0x873   : > { %1796 = vmatprep.subr.bf16.mxu1 %v4838_v50  ;;  %v4891_v50 = vld [vmem:[%s6300_s14 + $0xa0] sm:$0xff]  }
 0x876   : > { %1797 = vmatpush1.bf16.msra.mxu1 %v4836_v42  ;;  %v4893_v42 = vld [vmem:[%s6300_s14 + $0xe8] sm:$0xff]  }
 0x877   : > { %1798 = vmatprep.subr.bf16.mxu1 %v4844_v57  ;;  %v4899_v57 = vld [vmem:[%s6300_s14 + $0xb0] sm:$0xff]  }
 0x87a   : > { %1799 = vmatpush1.bf16.msra.mxu1 %v4842_v59  ;;  %v4901_v59 = vld [vmem:[%s6300_s14 + $0xf8] sm:$0xff]  }
 0x87b   : > { %1800 = vmatprep.subr.bf16.mxu1 %v4850_v61  ;;  %v4903_v61 = vld [vmem:[%s6300_s14 + $0xb8] sm:$0xff]  }
 0x87e   : > { %1801 = vmatpush1.bf16.msra.mxu1 %v4848_v63  ;;  %v1626_v63 = vsub.s32 3, %v5461_v11 }
 0x87f   : > { %1802 = vmatprep.subr.bf16.mxu1 %v4856_v1  ;;  %v1623_v1 = vrot.slane %v1609_v62, %v5488_v35 }
 0x882   : > { %1803 = vmatpush1.bf16.msra.mxu1 %v4854_v4  ;;  %v1627_v4 = vrot.slane %v1609_v62, %v1626_v63 }
 0x883   : > { %1804 = vmatprep.subr.bf16.mxu1 %v4862_v6 }
 0x886   : > { %1805 = vmatpush1.bf16.msra.mxu1 %v4860_v8 }
 0x887   : > { %1806 = vmatprep.subr.bf16.mxu1 %v4868_v13 }
 0x88a   : > { %1807 = vmatpush1.bf16.msra.mxu1 %v4866_v16 }
 0x88b   : > { %4379 = vmatprep.subr.bf16.mxu1 %v4872_v29 }
 0x8ff   : > { %v1553_v53 = vpop.xlane.xlu1 %1552 }
 0x900   : > { %v1554_v54 = vmul.f32 0.0078125, %v1553_v53  ;;  %v4895_v53 = vld [vmem:[%s6300_s14 + $0xa8] sm:$0xff]  }
 0x902   : > { %v1555_v55 = vsub.f32 %v1549_v40, %v1554_v54  ;;  %v4882_v40 = vld [vmem:[%s6300_s14 + $0x10] sm:$0xff]  }
 0x903   : > { %v4896_v54 = vld [vmem:[%s6300_s14 + $0x70] sm:$0xff]  }
 0x904   : > { %v1556_v56 = vmul.f32 %v1555_v55, %v1555_v55 }
 0x906   : > { %1557 = vadd.xlane.f32.xlu0 %v1556_v56  ;;  %v4898_v56 = vld [vmem:[%s6300_s14 + $0x30] sm:$0xff]  }
 0x993   : > { %v1558_v19 = vpop.xlane.xlu0 %1557 }
 0x994   : > { %v1559_v20 = vmul.f32 0.0078125, %v1558_v19 }
 0x996   : > { %v1560_v21 = vadd.f32 1e-12, %v1559_v20 }
 0x998   : > { %5042 = vrsqrt.f32 %v1560_v21 }
 0x9a2   : > { %v5043_v22 = vpop.eup %5042 }
 0x9a3   : > { %v1562_v24 = vmul.f32 %v5043_v22, %v1555_v55  ;;  %v4897_v55 = vld [vmem:[%s6300_s14 + $0xf0] sm:$0xff]  }
 0x9a5   : > { %v1569_v26 = vmul.f32 %v3994_v23, %v1562_v24 }
 0x9a7   : > { %v5694_v27 = vadd.f32 %v3995_v25, %v1569_v26 }
 0x9a9   : > { %v1610_v28 = vpack.c.bf16 %v5694_v27, %v5694_v27 }
 0x9ab   : > { %1825 = vmatmul.mubr.bf16.vlgmr.msra.gmra.mrb[36].mxu1 %v1610_v28  ;;  %1866 = vmatmul.mubr.bf16.vlgmr.msra.gmra.mrb[12].mxu0 %v1610_v28 }
 0x9ac   : > { %4380 = vmatpush3.bf16.msra.mxu1 %v4874_v31  ;;  %4402 = vmatpush3.bf16.msra.mxu0 %v4875_v32 }
 0x9ad   : > { %4381 = vmatprep.subr.bf16.mxu1 %v4876_v33  ;;  %4403 = vmatprep.subr.bf16.mxu0 %v4877_v34 }
 0x9b0   : > { %4382 = vmatpush3.bf16.msra.mxu1 %v4878_v36  ;;  %4404 = vmatpush3.bf16.msra.mxu0 %v4879_v37 }
 0x9b1   : > { %4383 = vmatprep.subr.bf16.mxu1 %v4880_v38  ;;  %4405 = vmatprep.subr.bf16.mxu0 %v4881_v39 }
 0x9b4   : > { %4384 = vmatpush3.bf16.msra.mxu1 %v4882_v40  ;;  %4406 = vmatpush3.bf16.msra.mxu0 %v4883_v41 }
 0x9b5   : > { %4385 = vmatprep.subr.bf16.mxu1 %v4884_v43  ;;  %4407 = vmatprep.subr.bf16.mxu0 %v4885_v44 }
 0x9b8   : > { %4386 = vmatpush3.bf16.msra.mxu1 %v4886_v45  ;;  %4408 = vmatpush3.bf16.msra.mxu0 %v4887_v9 }
 0x9b9   : > { %4387 = vmatprep.subr.bf16.mxu1 %v4888_v46  ;;  %4409 = vmatprep.subr.bf16.mxu0 %v4889_v47 }
 0x9bc   : > { %4388 = vmatpush3.bf16.msra.mxu1 %v4890_v48  ;;  %4410 = vmatpush3.bf16.msra.mxu0 %v4891_v50 }
 0x9bd   : > { %4389 = vmatprep.subr.bf16.mxu1 %v4892_v51  ;;  %4411 = vmatprep.subr.bf16.mxu0 %v4893_v42 }
 0x9c0   : > { %4390 = vmatpush3.bf16.msra.mxu1 %v4894_v52  ;;  %4412 = vmatpush3.bf16.msra.mxu0 %v4895_v53 }
 0x9c1   : > { %4391 = vmatprep.subr.bf16.mxu1 %v4896_v54  ;;  %4413 = vmatprep.subr.bf16.mxu0 %v4897_v55 }
 0x9c4   : > { %4392 = vmatpush3.bf16.msra.mxu1 %v4898_v56  ;;  %4414 = vmatpush3.bf16.msra.mxu0 %v4899_v57 }
 0x9c5   : > { %4393 = vmatprep.subr.bf16.mxu1 %v4900_v58  ;;  %4415 = vmatprep.subr.bf16.mxu0 %v4901_v59 }
 0x9c8   : > { %4394 = vmatpush3.bf16.msra.mxu1 %v4902_v60  ;;  %4416 = vmatpush3.bf16.msra.mxu0 %v4903_v61 }
 0x9c9   : > { %4624 = vmatprep.subr.bf16.mxu0 %v5149_v14 }
 0xa7e   : > { %v1826_v5 = vpop.f32.mrb[36].mxu1  ;;  %v1867_v6 = vpop.f32.mrb[12].mxu0 }
 0xa7f   : > { %v1827_v7 = vadd.f32 %v1826_v5, %v1615_v0  ;;  %v1868_v8 = vadd.f32 %v1867_v6, %v1623_v1  ;;  %v1828_v10 = vpop.f32.mrb[37].mxu1  ;;  %v1869_v13 = vpop.f32.mrb[13].mxu0 }
 0xa80   : > { %v1829_v16 = vadd.f32 %v1828_v10, %v1619_v2  ;;  %v1870_v17 = vadd.f32 %v1869_v13, %v1627_v4  ;;  %v1830_v18 = vpop.f32.mrb[38].mxu1  ;;  %v1871_v19 = vpop.f32.mrb[14].mxu0  ;;  %v4028_v4 = vld [vmem:[%s6301_s15] ss:$0 sm:$0xff] }
 0xa81   : > { %v1878_v20 = vmul.f32 0.044715, %v1827_v7  ;;  %v1880_v21 = vmul.f32 0.044715, %v1868_v8  ;;  %v1831_v22 = vpop.f32.mrb[39].mxu1  ;;  %v1872_v23 = vpop.f32.mrb[15].mxu0 }
 0xa82   : > { %v1879_v24 = vmul.f32 0.044715, %v1829_v16  ;;  %v1881_v25 = vmul.f32 0.044715, %v1870_v17  ;;  %v1874_v46 = vmul.f32 0.5, %v1827_v7  ;;  %v1875_v50 = vmul.f32 0.5, %v1829_v16 }
 0xa83   : > { %v1882_v26 = vmul.f32 %v1878_v20, %v1827_v7  ;;  %v1884_v28 = vmul.f32 %v1880_v21, %v1868_v8  ;;  %v1877_v52 = vmul.f32 0.5, %v1870_v17  ;;  %v1876_v56 = vmul.f32 0.5, %v1868_v8  ;;  %v4904_v21 = vld [vmem:[%s6292_s6 + $0xc0] ss:$12 sps:$4 sm:$0xff]   ;;  %v4906_v22 = vld [vmem:[%s6292_s6 + $0xc4] ss:$12 sps:$4 sm:$0xff]  }
 0xa84   : > { %v1883_v29 = vmul.f32 %v1879_v24, %v1829_v16  ;;  %v1885_v30 = vmul.f32 %v1881_v25, %v1870_v17  ;;  %v4907_v23 = vld [vmem:[%s6292_s6 + $0xc8] ss:$12 sps:$4 sm:$0xff]   ;;  %2465 = vmatprep.subr.bf16.mxu1 %v4906_v22  ;;  %v4908_v25 = vld [vmem:[%s6292_s6 + $0xd8] ss:$12 sps:$4 sm:$0xff]  }
 0xa85   : > { %v1886_v31 = vmul.f32 %v1882_v26, %v1827_v7  ;;  %v1888_v32 = vmul.f32 %v1884_v28, %v1868_v8  ;;  %v4910_v24 = vld [vmem:[%s6292_s6 + $0xdc] ss:$12 sps:$4 sm:$0xff]   ;;  %v4914_v26 = vld [vmem:[%s6292_s6 + $0xf4] ss:$12 sps:$4 sm:$0xff]  }
 0xa86   : > { %v1887_v33 = vmul.f32 %v1883_v29, %v1829_v16  ;;  %v1889_v34 = vmul.f32 %v1885_v30, %v1870_v17  ;;  %v4912_v28 = vld [vmem:[%s6292_s6 + $0xf0] ss:$12 sps:$4 sm:$0xff]  }
 0xa87   : > { %v1890_v36 = vadd.f32 %v1886_v31, %v1827_v7  ;;  %v1892_v37 = vadd.f32 %v1888_v32, %v1868_v8 }
 0xa88   : > { %v1891_v38 = vadd.f32 %v1887_v33, %v1829_v16  ;;  %v1893_v39 = vadd.f32 %v1889_v34, %v1870_v17  ;;  %v4915_v33 = vld [vmem:[%s6292_s6 + $0xf8] ss:$12 sps:$4 sm:$0xff]  }
 0xa89   : > { %v1894_v40 = vmul.f32 0.7978846, %v1890_v36  ;;  %v1896_v44 = vmul.f32 0.7978846, %v1892_v37  ;;  %v4918_v34 = vld [vmem:[%s6292_s6 + $0x10c] ss:$12 sps:$4 sm:$0xff]  }
 0xa8a   : > { %v1895_v41 = vmul.f32 0.7978846, %v1891_v38  ;;  %v1897_v43 = vmul.f32 0.7978846, %v1893_v39  ;;  %v4916_v36 = vld [vmem:[%s6292_s6 + $0x108] ss:$12 sps:$4 sm:$0xff]  }
 0xa8b   : > { %5044 = vtanh.f32 %v1894_v40  ;;  %v4919_v37 = vld [vmem:[%s6292_s6 + $0x110] ss:$12 sps:$4 sm:$0xff]   ;;  %v4920_v39 = vld [vmem:[%s6292_s6 + $0x120] ss:$12 sps:$4 sm:$0xff]   ;;  %v4923_v40 = vld [vmem:[%s6292_s6 + $0x128] ss:$12 sps:$4 sm:$0xff]  }
 0xa8c   : > { %5046 = vtanh.f32 %v1895_v41  ;;  %v4922_v38 = vld [vmem:[%s6292_s6 + $0x124] ss:$12 sps:$4 sm:$0xff]   ;;  %v4926_v41 = vld [vmem:[%s6292_s6 + $0x13c] ss:$12 sps:$4 sm:$0xff]  }
 0xa8d   : > { %5048 = vtanh.f32 %v1897_v43  ;;  %v4924_v43 = vld [vmem:[%s6292_s6 + $0x138] ss:$12 sps:$4 sm:$0xff]  }
 0xa8e   : > { %5050 = vtanh.f32 %v1896_v44  ;;  %v4927_v44 = vld [vmem:[%s6292_s6 + $0x140] ss:$12 sps:$4 sm:$0xff]  }
 0xa95   : > { %v5045_v45 = vpop.eup %5044 }
 0xa96   : > { %v5047_v9 = vpop.eup %5046  ;;  %v1902_v47 = vadd.f32 1.0, %v5045_v45  ;;  %v4928_v45 = vld [vmem:[%s6292_s6 + $0x150] ss:$12 sps:$4 sm:$0xff]  }
 0xa97   : > { %v5049_v48 = vpop.eup %5048  ;;  %v1903_v51 = vadd.f32 1.0, %v5047_v9  ;;  %v4930_v9 = vld [vmem:[%s6292_s6 + $0x154] ss:$12 sps:$4 sm:$0xff]  }
 0xa98   : > { %v5051_v42 = vpop.eup %5050  ;;  %v1905_v53 = vadd.f32 1.0, %v5049_v48  ;;  %v1906_v54 = vmul.f32 %v1902_v47, %v1874_v46  ;;  %v4931_v46 = vld [vmem:[%s6292_s6 + $0x158] ss:$12 sps:$4 sm:$0xff]   ;;  %v4932_v48 = vld [vmem:[%s6292_s6 + $0x168] ss:$12 sps:$4 sm:$0xff]  }
 0xa99   : > { %v1907_v55 = vmul.f32 %v1903_v51, %v1875_v50  ;;  %v1904_v57 = vadd.f32 1.0, %v5051_v42  ;;  %v4934_v47 = vld [vmem:[%s6292_s6 + $0x16c] ss:$12 sps:$4 sm:$0xff]   ;;  %v4935_v50 = vld [vmem:[%s6292_s6 + $0x170] ss:$12 sps:$4 sm:$0xff]  }
 0xa9a   : > { %v1909_v58 = vmul.f32 %v1905_v53, %v1877_v52  ;;  %v1975_v62 = vpack.c.bf16 %v1906_v54, %v1906_v54  ;;  %v4061_v54 = vld [vmem:[%s6302_s16] ss:$0 sm:$0xff] }
 0xa9b   : > { %v1976_v59 = vpack.c.bf16 %v1907_v55, %v1907_v55  ;;  %v1908_v60 = vmul.f32 %v1904_v57, %v1876_v56  ;;  %v4062_v56 = vld [vmem:[%s6303_s17] ss:$0 sm:$0xff] }
 0xa9c   : > { %v1978_v61 = vpack.c.bf16 %v1909_v58, %v1909_v58 }
 0xa9d   : > { %2209 = vmatprep.mubr.bf16.mxu1 %v1976_v59  ;;  %v1977_v0 = vpack.c.bf16 %v1908_v60, %v1908_v60  ;;  %v4095_v60 = vld [vmem:[%s6293_s7 + $0x3] sm:$0x7] }
 0xa9e   : > { %2249 = vmatprep.mubr.bf16.mxu0 %v1978_v61  ;;  %2210 = vmatmul.mubr.bf16.vlgmr.msra.gmra.mrb[40].mxu1 %v1975_v62  ;;  %v2325_v61 = vrot.slane %v4095_v60, %v5464_v12  ;;  %v2333_v62 = vrot.slane %v4095_v60, %v5488_v35 }
 0xa9f   : > { %2250 = vmatmul.mubr.bf16.vlgmr.msra.gmra.mrb[16].mxu0 %v1977_v0  ;;  %2497 = vmatprep.mubr.bf16.mxu1 %v5146_v3  ;;  %v2329_v0 = vrot.slane %v4095_v60, %v5470_v15 }
 0xaa0   : > { %4640 = vmatprep.mubr.msk.bf16.mxu0 %vm5148_vm0, %v5149_v14  ;;  %4625 = vmatpush3.bf16.msra.mxu0 %v4907_v23 }
 0xaa1   : > { %2466 = vmatpush1.bf16.msra.mxu1 %v4904_v21  ;;  %4626 = vmatprep.subr.bf16.mxu0 %v5149_v14 }
 0xaa2   : > { %2467 = vmatprep.subr.bf16.mxu1 %v4910_v24 }
 0xaa5   : > { %2468 = vmatpush1.bf16.msra.mxu1 %v4908_v25 }
 0xaa6   : > { %2469 = vmatprep.subr.bf16.mxu1 %v4914_v26 }
 0xaa9   : > { %2470 = vmatpush1.bf16.msra.mxu1 %v4912_v28 }
 0xaaa   : > { %2471 = vmatprep.subr.bf16.mxu1 %v4918_v34 }
 0xaad   : > { %2472 = vmatpush1.bf16.msra.mxu1 %v4916_v36 }
 0xaae   : > { %2473 = vmatprep.subr.bf16.mxu1 %v4922_v38 }
 0xab1   : > { %2474 = vmatpush1.bf16.msra.mxu1 %v4920_v39 }
 0xab2   : > { %2475 = vmatprep.subr.bf16.mxu1 %v4926_v41 }
 0xab5   : > { %2476 = vmatpush1.bf16.msra.mxu1 %v4924_v43 }
 0xab6   : > { %2477 = vmatprep.subr.bf16.mxu1 %v4930_v9 }
 0xab9   : > { %2478 = vmatpush1.bf16.msra.mxu1 %v4928_v45 }
 0xaba   : > { %2479 = vmatprep.subr.bf16.mxu1 %v4934_v47 }
 0xabd   : > { %2480 = vmatpush1.bf16.msra.mxu1 %v4932_v48 }
 0xabe   : > { %4644 = vmatprep.subr.bf16.mxu1 %v5149_v14 }
 0xb71   : > { %v4395_v1 = vpop.f32.mrb[40].mxu1 }
 0xb72   : > { %v4417_v2 = vpop.f32.mrb[16].mxu0  ;;  %v4396_v5 = vpop.f32.mrb[41].mxu1 }
 0xb73   : > { %v4397_v6 = vadd.f32 %v4396_v5, %v4395_v1  ;;  %v4418_v7 = vpop.f32.mrb[17].mxu0  ;;  %v4398_v8 = vpop.f32.mrb[42].mxu1 }
 0xb74   : > { %v4419_v10 = vadd.f32 %v4418_v7, %v4417_v2  ;;  %v4420_v13 = vpop.f32.mrb[18].mxu0  ;;  %v4399_v16 = vpop.f32.mrb[43].mxu1 }
 0xb75   : > { %v2212_v17 = vadd.f32 %v4397_v6, %v4028_v4  ;;  %v4421_v18 = vpop.f32.mrb[19].mxu0 }
 0xb77   : > { %v2252_v19 = vadd.f32 %v4419_v10, %v2212_v17 }
 0xb79   : > { %v2257_v20 = vadd.f32 %v2252_v19, %v5694_v27  ;;  %v4911_v27 = vld [vmem:[%s6292_s6 + $0xe0] ss:$12 sps:$4 sm:$0xff]  }
 0xb7a   : > { %4627 = vmatpush3.bf16.msra.mxu0 %v4911_v27 }
 0xb7b   : > { %2260 = vadd.xlane.f32.xlu0 %v2257_v20  ;;  %4628 = vmatprep.subr.bf16.mxu0 %v5149_v14 }
 0xb7e   : > { %4629 = vmatpush3.bf16.msra.mxu0 %v4915_v33 }
 0xb7f   : > { %4630 = vmatprep.subr.bf16.mxu0 %v5149_v14 }
 0xb82   : > { %4631 = vmatpush3.bf16.msra.mxu0 %v4919_v37 }
 0xb83   : > { %4632 = vmatprep.subr.bf16.mxu0 %v5149_v14 }
 0xb86   : > { %4633 = vmatpush3.bf16.msra.mxu0 %v4923_v40 }
 0xb87   : > { %4634 = vmatprep.subr.bf16.mxu0 %v5149_v14 }
 0xb8a   : > { %4635 = vmatpush3.bf16.msra.mxu0 %v4927_v44 }
 0xb8b   : > { %4636 = vmatprep.subr.bf16.mxu0 %v5149_v14 }
 0xb8e   : > { %4637 = vmatpush3.bf16.msra.mxu0 %v4931_v46 }
 0xb8f   : > { %4638 = vmatprep.subr.bf16.mxu0 %v5149_v14 }
 0xb92   : > { %4639 = vmatpush3.bf16.msra.mxu0 %v4935_v50 }
 0xb93   : > { %4668 = vmatprep.subr.bf16.mxu0 %v5149_v14 }
 0xc08   : > { %v2261_v29 = vpop.xlane.xlu0 %2260 }
 0xc09   : > { %v2262_v30 = vmul.f32 0.0078125, %v2261_v29 }
 0xc0b   : > { %v2263_v31 = vsub.f32 %v2257_v20, %v2262_v30 }
 0xc0d   : > { %v2264_v32 = vmul.f32 %v2263_v31, %v2263_v31 }
 0xc0f   : > { %2265 = vadd.xlane.f32.xlu1 %v2264_v32 }
 0xc9c   : > { %v2266_v51 = vpop.xlane.xlu1 %2265 }
 0xc9d   : > { %v2267_v42 = vmul.f32 0.0078125, %v2266_v51 }
 0xc9f   : > { %v2268_v52 = vadd.f32 1e-12, %v2267_v42 }
 0xca1   : > { %5052 = vrsqrt.f32 %v2268_v52 }
 0xcab   : > { %v5053_v53 = vpop.eup %5052 }
 0xcac   : > { %v2270_v55 = vmul.f32 %v5053_v53, %v2263_v31 }
 0xcae   : > { %v2277_v57 = vmul.f32 %v4061_v54, %v2270_v55 }
 0xcb0   : > { %v5898_v58 = vadd.f32 %v4062_v56, %v2277_v57 }
 0xcb2   : > { %v2320_v59 = vpack.c.bf16 %v5898_v58, %v5898_v58 }
 0xcb4   : > { %2498 = vmatmul.mubr.bf16.vlgmr.msra.gmra.mrb[44].mxu1 %v2320_v59  ;;  %4641 = vmatmul.mubr.bf16.vlgmr.msra.gmra.mrb[20].mxu0 %v2320_v59 }
 0xcb5   : > { %4646 = vmatprep.mubr.msk.bf16.mxu1 %vm5148_vm0, %v5149_v14  ;;  %4670 = vmatprep.mubr.msk.bf16.mxu0 %vm5148_vm0, %v5149_v14 }
 0xd87   : > { %v2499_v1 = vpop.f32.mrb[44].mxu1  ;;  %v2540_v2 = vpop.f32.mrb[20].mxu0 }
 0xd88   : > { %v2500_v4 = vadd.f32 %v2499_v1, %v2325_v61  ;;  %v2541_v5 = vadd.f32 %v2540_v2, %v2333_v62  ;;  %v2501_v6 = vpop.f32.mrb[45].mxu1  ;;  %v4642_v7 = vpop.f32.mrb[21].mxu0 }
 0xd89   : > { %v2502_v8 = vadd.f32 %v2501_v6, %v2329_v0  ;;  %v2503_v10 = vpop.f32.mrb[46].mxu1  ;;  %v2543_v13 = vpop.f32.mrb[22].mxu0 }
 0xd8a   : > { %v2546_v16 = vpack.c.bf16 %v2500_v4, %v2500_v4  ;;  %v5912_v17 = vpack.c.bf16 %v2541_v5, %v2541_v5  ;;  %v2504_v18 = vpop.f32.mrb[47].mxu1  ;;  %v4643_v19 = vpop.f32.mrb[23].mxu0 }
 0xd8b   : > { %v2547_v20 = vpack.c.bf16 %v2502_v8, %v2502_v8 }
 0xd8c   : > { %2550 = vrot.lane.b32.xlu1 %v2546_v16, %s5152_s25  ;;  %v2806_v21 = vsel %vm1238_vm3, %v5912_v17, 0 }
 0xd8d   : > { %4669 = vmatpush3.bf16.msra.mxu0 %v2806_v21  ;;  %2557 = vrot.lane.b32.xlu0 %v2547_v20, %s5152_s25  ;;  %v2574_v22 = vsel %vm1001_vm2, %v2547_v20, 0 }
 0xd8e   : > { %4645 = vmatpush3.bf16.xpose.msra.mxu1 %v2574_v22  ;;  %4680 = vmatprep.subr.bf16.mxu0 %v5149_v14 }
 0xd8f   : > { %4650 = vmatprep.subr.bf16.mxu1 %v5149_v14 }
 0xd90   : > { %2559 = vrot.lane.b32.xlu1 %v2547_v20, %s6337_s1 }
 0xd91   : > { %2552 = vrot.lane.b32.xlu0 %v2546_v16, %s6337_s1 }
 0xd94   : > { %2561 = vrot.lane.b32.xlu1 %v2547_v20, %s6338_s22 }
 0xd95   : > { %2554 = vrot.lane.b32.xlu0 %v2546_v16, %s6338_s22  ;;  %4647 = vmatmul.mubr.msk.bf16.vlgmr.msra.gmra.mrb[48].mxu1 %vm1001_vm2, %v2546_v16 }
 0xd96   : > { %4652 = vmatprep.mubr.msk.bf16.mxu1 %vm5148_vm0, %v5149_v14 }
 0xdfe   : > { %v2551_v23 = vpop.permute.xlu1 %2550 }
 0xdff   : > { %v2558_v24 = vpop.permute.xlu0 %2557 }
 0xe00   : > { %v2620_v27 = vsel %vm1001_vm2, %v2558_v24, 0 }
 0xe01   : > { %4651 = vmatpush3.bf16.xpose.msra.mxu1 %v2620_v27 }
 0xe02   : > { %4656 = vmatprep.subr.bf16.mxu1 %v5149_v14  ;;  %v2560_v25 = vpop.permute.xlu1 %2559 }
 0xe03   : > { %v2666_v26 = vsel %vm1001_vm2, %v2560_v25, 0  ;;  %v2553_v29 = vpop.permute.xlu0 %2552 }
 0xe06   : > { %v2562_v28 = vpop.permute.xlu1 %2561 }
 0xe07   : > { %v2712_v30 = vsel %vm1001_vm2, %v2562_v28, 0  ;;  %v2555_v31 = vpop.permute.xlu0 %2554 }
 0xe08   : > { %4653 = vmatmul.mubr.msk.bf16.vlgmr.msra.gmra.mrb[52].mxu1 %vm1001_vm2, %v2551_v23 }
 0xe09   : > { %4657 = vmatpush3.bf16.xpose.msra.mxu1 %v2666_v26  ;;  %4658 = vmatprep.mubr.msk.bf16.mxu1 %vm5148_vm0, %v5149_v14 }
 0xe0a   : > { %4662 = vmatprep.subr.bf16.mxu1 %v5149_v14 }
 0xe10   : > { %4659 = vmatmul.mubr.msk.bf16.vlgmr.msra.gmra.mrb[56].mxu1 %vm1001_vm2, %v2553_v29 }
 0xe11   : > { %4663 = vmatpush3.bf16.xpose.msra.mxu1 %v2712_v30  ;;  %4664 = vmatprep.mubr.msk.bf16.mxu1 %vm5148_vm0, %v5149_v14 }
 0xe12   : > { %4674 = vmatprep.subr.bf16.mxu1 %v5149_v14 }
 0xe18   : > { %4665 = vmatmul.mubr.msk.bf16.vlgmr.msra.gmra.mrb[60].mxu1 %vm1001_vm2, %v2555_v31 }
 0xe19   : > { %4676 = vmatprep.mubr.msk.bf16.mxu1 %vm5148_vm0, %v5149_v14 }
 0xe68   : > { %v2610_v32 = vpop.f32.mrb[48].mxu1 }
 0xe69   : > { %v2611_v33 = vadd.f32 %v2610_v32, %v5514_v49  ;;  %v4648_v34 = vpop.f32.mrb[49].mxu1 }
 0xe6a   : > { %v2613_v36 = vpop.f32.mrb[50].mxu1 }
 0xe6b   : > { %v4649_v37 = vpop.f32.mrb[51].mxu1  ;;  %v2754_v38 = vsel %vm1186_vm4, %v2611_v33, -inf }
 0xe6c   : > { %2755 = vmax.xlane.f32.xlu1 %v2754_v38 }
 0xedb   : > { %v2656_v39 = vpop.f32.mrb[52].mxu1 }
 0xedc   : > { %v2657_v40 = vadd.f32 %v2656_v39, %v5514_v49  ;;  %v4654_v41 = vpop.f32.mrb[53].mxu1 }
 0xedd   : > { %v2659_v43 = vpop.f32.mrb[54].mxu1 }
 0xede   : > { %v4655_v44 = vpop.f32.mrb[55].mxu1  ;;  %v2757_v45 = vsel %vm1186_vm4, %v2657_v40, -inf }
 0xedf   : > { %2758 = vmax.xlane.f32.xlu0 %v2757_v45 }
 0xee3   : > { %v2702_v9 = vpop.f32.mrb[56].mxu1 }
 0xee4   : > { %v2703_v46 = vadd.f32 %v2702_v9, %v5514_v49  ;;  %v4660_v47 = vpop.f32.mrb[57].mxu1 }
 0xee5   : > { %v2705_v48 = vpop.f32.mrb[58].mxu1  ;;  %v4936_v47 = vld [vmem:[%s6294_s8 + $0x40] sm:$0xff]  }
 0xee6   : > { %v4661_v50 = vpop.f32.mrb[59].mxu1  ;;  %v2760_v51 = vsel %vm1186_vm4, %v2703_v46, -inf  ;;  %v4937_v48 = vld [vmem:[%s6294_s8 + $0x48] sm:$0xff]  }
 0xee7   : > { %2761 = vmax.xlane.f32.xlu0 %v2760_v51 }
 0xeeb   : > { %v2748_v42 = vpop.f32.mrb[60].mxu1 }
 0xeec   : > { %v2749_v52 = vadd.f32 %v2748_v42, %v5514_v49  ;;  %v4666_v53 = vpop.f32.mrb[61].mxu1  ;;  %v4938_v42 = vld [vmem:[%s6294_s8 + $0x50] sm:$0xff]  }
 0xeed   : > { %v2751_v54 = vpop.f32.mrb[62].mxu1 }
 0xeee   : > { %v4667_v55 = vpop.f32.mrb[63].mxu1  ;;  %v2763_v56 = vsel %vm1186_vm4, %v2749_v52, -inf  ;;  %v4939_v54 = vld [vmem:[%s6294_s8 + $0x58] sm:$0xff]  }
 0xeef   : > { %2764 = vmax.xlane.f32.xlu1 %v2763_v56 }
 0xef9   : > { %v2756_v57 = vpop.xlane.xlu1 %2755 }
 0xefa   : > { %v2766_v59 = vsub.f32 %v2611_v33, %v2756_v57 }
 0xefc   : > { %v2770_v60 = vmul.f32 1.442695, %v2766_v59  ;;  %v4940_v59 = vld [vmem:[%s6294_s8 + $0x60] sm:$0xff]  }
 0xefe   : > { %5054 = vpow2.f32 %v2770_v60 }
 0xf08   : > { %v5055_v61 = vpop.eup %5054 }
 0xf09   : > { %v2778_v62 = vsel %vm1186_vm4, %v5055_v61, 0.0 }
 0xf0a   : > { %2779 = vadd.xlane.f32.xlu0 %v2778_v62  ;;  %v4942_v62 = vld [vmem:[%s6294_s8 + $0x70] sm:$0xff]  }
 0xf6c   : > { %v2759_v0 = vpop.xlane.xlu0 %2758 }
 0xf6d   : > { %v2767_v1 = vsub.f32 %v2657_v40, %v2759_v0  ;;  %v4943_v0 = vld [vmem:[%s6294_s8 + $0x78] sm:$0xff]  }
 0xf6f   : > { %v2772_v2 = vmul.f32 1.442695, %v2767_v1 }
 0xf71   : > { %5056 = vpow2.f32 %v2772_v2 }
 0xf74   : > { %v2762_v4 = vpop.xlane.xlu0 %2761 }
 0xf75   : > { %v2768_v49 = vsub.f32 %v2703_v46, %v2762_v4 }
 0xf77   : > { %v2774_v5 = vmul.f32 1.442695, %v2768_v49 }
 0xf79   : > { %5058 = vpow2.f32 %v2774_v5 }
 0xf7b   : > { %v5057_v6 = vpop.eup %5056 }
 0xf7c   : > { %v2781_v7 = vsel %vm1186_vm4, %v5057_v6, 0.0  ;;  %v2765_v16 = vpop.xlane.xlu1 %2764 }
 0xf7d   : > { %2782 = vadd.xlane.f32.xlu1 %v2781_v7  ;;  %v2769_v18 = vsub.f32 %v2749_v52, %v2765_v16  ;;  %v4145_v16 = vld [vmem:[%s6295_s9 + $0x1] ss:$0 sm:$0xff] }
 0xf7f   : > { %v2776_v19 = vmul.f32 1.442695, %v2769_v18 }
 0xf83   : > { %v5059_v8 = vpop.eup %5058 }
 0xf84   : > { %v2784_v10 = vsel %vm1186_vm4, %v5059_v8, 0.0 }
 0xf85   : > { %2785 = vadd.xlane.f32.xlu0 %v2784_v10 }
 0xf8e   : > { %2566 = vrot.lane.b32.xlu1 %v5912_v17, %s6337_s1 }
 0xf97   : > { %v2780_v13 = vpop.xlane.xlu0 %2779 }
 0xf98   : > { %5060 = vrcp.f32 %v2780_v13 }
 0xf99   : > { %5062 = vpow2.f32 %v2776_v19 }
 0xf9b   : > { %2564 = vrot.lane.b32.xlu0 %v5912_v17, %s5152_s25 }
 0xfa2   : > { %v5061_v20 = vpop.eup %5060 }
 0xfa3   : > { %v2794_v21 = vmul.f32 %v5061_v20, %v5055_v61  ;;  %v5063_v23 = vpop.eup %5062  ;;  %v4941_v61 = vld [vmem:[%s6294_s8 + $0x68] sm:$0xff]  }
 0xfa4   : > { %v2787_v24 = vsel %vm1186_vm4, %v5063_v23, 0.0 }
 0xfa5   : > { %v2798_v22 = vpack.c.bf16 %v2794_v21, %v2794_v21 }
 0xfa7   : > { %4671 = vmatmul.mubr.msk.bf16.vlgmr.msra.gmra.mrb[24].mxu0 %vm1186_vm4, %v2798_v22 }
 0xfa8   : > { %4682 = vmatprep.mubr.msk.bf16.mxu0 %vm5148_vm0, %v5149_v14 }
 0xfb2   : > { %2788 = vadd.xlane.f32.xlu1 %v2787_v24  ;;  %v4944_v24 = vld [vmem:[%s6298_s12 + $0x100] ss:$16 sps:$4 sm:$0xff]  }
 0xfc3   : > { %2568 = vrot.lane.b32.xlu1 %v5912_v17, %s6338_s22 }
0x100a   : > { %v2783_v27 = vpop.xlane.xlu1 %2782 }
0x100b   : > { %5064 = vrcp.f32 %v2783_v27  ;;  %v4947_v27 = vld [vmem:[%s6298_s12 + $0x108] ss:$16 sps:$4 sm:$0xff]  }
0x100e   : > { %v2567_v25 = vpop.permute.xlu1 %2566 }
0x100f   : > { %v2898_v26 = vsel %vm1238_vm3, %v2567_v25, 0  ;;  %v4949_v25 = vld [vmem:[%s6298_s12 + $0x10c] ss:$16 sps:$4 sm:$0xff]  }
0x1010   : > { %4681 = vmatpush3.bf16.msra.mxu0 %v2898_v26  ;;  %v4955_v26 = vld [vmem:[%s6298_s12 + $0x12c] ss:$16 sps:$4 sm:$0xff]  }
0x1011   : > { %4692 = vmatprep.subr.bf16.mxu0 %v5149_v14 }
0x1012   : > { %v2786_v28 = vpop.xlane.xlu0 %2785 }
0x1013   : > { %5066 = vrcp.f32 %v2786_v28  ;;  %v4950_v28 = vld [vmem:[%s6298_s12 + $0x120] ss:$16 sps:$4 sm:$0xff]  }
0x1015   : > { %v5065_v29 = vpop.eup %5064 }
0x1016   : > { %v2795_v30 = vmul.f32 %v5065_v29, %v5057_v6  ;;  %v2565_v31 = vpop.permute.xlu0 %2564  ;;  %v4953_v29 = vld [vmem:[%s6298_s12 + $0x128] ss:$16 sps:$4 sm:$0xff]  }
0x1017   : > { %v2852_v32 = vsel %vm1238_vm3, %v2565_v31, 0  ;;  %v4961_v31 = vld [vmem:[%s6298_s12 + $0x14c] ss:$16 sps:$4 sm:$0xff]  }
0x1018   : > { %4675 = vmatpush3.bf16.msra.mxu1 %v2852_v32  ;;  %v2799_v33 = vpack.c.bf16 %v2795_v30, %v2795_v30  ;;  %v4958_v30 = vld [vmem:[%s6298_s12 + $0x144] ss:$16 sps:$4 sm:$0xff]   ;;  %v4956_v32 = vld [vmem:[%s6298_s12 + $0x140] ss:$16 sps:$4 sm:$0xff]  }
0x1019   : > { %4686 = vmatprep.subr.bf16.mxu1 %v5149_v14 }
0x101b   : > { %4677 = vmatmul.mubr.msk.bf16.vlgmr.msra.gmra.mrb[64].mxu1 %vm1186_vm4, %v2799_v33  ;;  %v4959_v33 = vld [vmem:[%s6298_s12 + $0x148] ss:$16 sps:$4 sm:$0xff]  }
0x101c   : > { %4688 = vmatprep.mubr.msk.bf16.mxu1 %vm5148_vm0, %v5149_v14 }
0x101d   : > { %v5067_v17 = vpop.eup %5066 }
0x101e   : > { %v2796_v34 = vmul.f32 %v5067_v17, %v5059_v8 }
0x1020   : > { %v2800_v36 = vpack.c.bf16 %v2796_v34, %v2796_v34 }
0x1022   : > { %4683 = vmatmul.mubr.msk.bf16.vlgmr.msra.gmra.mrb[28].mxu0 %vm1186_vm4, %v2800_v36 }
0x1023   : > { %4708 = vmatprep.mubr.msk.bf16.mxu0 %vm5148_vm0, %v5149_v14  ;;  %4693 = vmatpush3.bf16.msra.mxu0 %v4936_v47  ;;  %v4979_v47 = vld [vmem:[%s6298_s12 + $0x1ac] ss:$16 sps:$4 sm:$0xff]  }
0x1024   : > { %4694 = vmatprep.subr.bf16.mxu0 %v5149_v14 }
0x1027   : > { %4695 = vmatpush3.bf16.msra.mxu0 %v4937_v48  ;;  %v4974_v48 = vld [vmem:[%s6298_s12 + $0x1a0] ss:$16 sps:$4 sm:$0xff]  }
0x1028   : > { %4696 = vmatprep.subr.bf16.mxu0 %v5149_v14 }
0x102b   : > { %4697 = vmatpush3.bf16.msra.mxu0 %v4938_v42  ;;  %v4982_v42 = vld [vmem:[%s6298_s12 + $0x1c4] ss:$16 sps:$4 sm:$0xff]  }
0x102c   : > { %4698 = vmatprep.subr.bf16.mxu0 %v5149_v14 }
0x102f   : > { %4699 = vmatpush3.bf16.msra.mxu0 %v4939_v54  ;;  %v4988_v54 = vld [vmem:[%s6298_s12 + $0x1e4] ss:$16 sps:$4 sm:$0xff]  }
0x1030   : > { %4700 = vmatprep.subr.bf16.mxu0 %v5149_v14 }
0x1033   : > { %4701 = vmatpush3.bf16.msra.mxu0 %v4940_v59 }
0x1034   : > { %4702 = vmatprep.subr.bf16.mxu0 %v5149_v14 }
0x1037   : > { %4703 = vmatpush3.bf16.msra.mxu0 %v4941_v61 }
0x1038   : > { %4704 = vmatprep.subr.bf16.mxu0 %v5149_v14 }
0x103b   : > { %4705 = vmatpush3.bf16.msra.mxu0 %v4942_v62 }
0x103c   : > { %4706 = vmatprep.subr.bf16.mxu0 %v5149_v14 }
0x103f   : > { %v2789_v37 = vpop.xlane.xlu1 %2788  ;;  %4707 = vmatpush3.bf16.msra.mxu0 %v4943_v0  ;;  %v4156_v0 = vld [vmem:[%s6296_s10 + $0x1] ss:$0 sm:$0xff] }
0x1040   : > { %5068 = vrcp.f32 %v2789_v37  ;;  %3403 = vmatprep.subr.bf16.mxu0 %v4949_v25  ;;  %v5008_v25 = vld [vmem:[%s6300_s14 + $0x160] sm:$0xff]  }
0x1043   : > { %v2569_v38 = vpop.permute.xlu1 %2568 }
0x1044   : > { %v2944_v39 = vsel %vm1238_vm3, %v2569_v38, 0  ;;  %v4964_v38 = vld [vmem:[%s6298_s12 + $0x164] ss:$16 sps:$4 sm:$0xff]  }
0x1045   : > { %4687 = vmatpush3.bf16.msra.mxu1 %v2944_v39  ;;  %v4967_v39 = vld [vmem:[%s6298_s12 + $0x16c] ss:$16 sps:$4 sm:$0xff]  }
0x104a   : > { %v5069_v40 = vpop.eup %5068 }
0x104b   : > { %v2797_v41 = vmul.f32 %v5069_v40, %v5063_v23  ;;  %v4962_v40 = vld [vmem:[%s6298_s12 + $0x160] ss:$16 sps:$4 sm:$0xff]  }
0x104d   : > { %v2801_v43 = vpack.c.bf16 %v2797_v41, %v2797_v41  ;;  %v4965_v41 = vld [vmem:[%s6298_s12 + $0x168] ss:$16 sps:$4 sm:$0xff]  }
0x104f   : > { %4689 = vmatmul.mubr.msk.bf16.vlgmr.msra.gmra.mrb[68].mxu1 %vm1186_vm4, %v2801_v43  ;;  %v4970_v43 = vld [vmem:[%s6298_s12 + $0x184] ss:$16 sps:$4 sm:$0xff]  }
0x1050   : > { %3394 = vmatprep.mubr.bf16.mxu1 %v5146_v3 }
0x107a   : > { %v2842_v44 = vpop.f32.mrb[24].mxu0 }
0x107b   : > { %v4672_v45 = vpop.f32.mrb[25].mxu0 }
0x107c   : > { %v2845_v9 = vpop.f32.mrb[26].mxu0  ;;  %v4968_v45 = vld [vmem:[%s6298_s12 + $0x180] ss:$16 sps:$4 sm:$0xff]  }
0x107d   : > { %v4673_v46 = vpop.f32.mrb[27].mxu0  ;;  %v4971_v9 = vld [vmem:[%s6298_s12 + $0x188] ss:$16 sps:$4 sm:$0xff]  }
0x107e   : > { %v4976_v46 = vld [vmem:[%s6298_s12 + $0x1a4] ss:$16 sps:$4 sm:$0xff]  }
0x10ee   : > { %v2888_v50 = vpop.f32.mrb[64].mxu1 }
0x10ef   : > { %2987 = vrot.lane.b32.xlu0 %v2888_v50, %s6338_s22  ;;  %v4678_v51 = vpop.f32.mrb[65].mxu1  ;;  %v4977_v50 = vld [vmem:[%s6298_s12 + $0x1a8] ss:$16 sps:$4 sm:$0xff]   ;;  %s6341_s22 = smov %s6340_s29 }
0x10f0   : > { %v2891_v52 = vpop.f32.mrb[66].mxu1  ;;  %v4980_v51 = vld [vmem:[%s6298_s12 + $0x1c0] ss:$16 sps:$4 sm:$0xff]  }
0x10f1   : > { %v4679_v53 = vpop.f32.mrb[67].mxu1  ;;  %v4983_v52 = vld [vmem:[%s6298_s12 + $0x1c8] ss:$16 sps:$4 sm:$0xff]  }
0x10f2   : > { %v4985_v53 = vld [vmem:[%s6298_s12 + $0x1cc] ss:$16 sps:$4 sm:$0xff]  }
0x10f5   : > { %v2934_v55 = vpop.f32.mrb[28].mxu0 }
0x10f6   : > { %2991 = vrot.lane.b32.xlu1 %v2934_v55, %s6337_s1  ;;  %v4684_v56 = vpop.f32.mrb[29].mxu0  ;;  %v4991_v55 = vld [vmem:[%s6298_s12 + $0x1ec] ss:$16 sps:$4 sm:$0xff]  }
0x10f7   : > { %v2937_v57 = vpop.f32.mrb[30].mxu0  ;;  %v4986_v56 = vld [vmem:[%s6298_s12 + $0x1e0] ss:$16 sps:$4 sm:$0xff]  }
0x10f8   : > { %v4685_v60 = vpop.f32.mrb[31].mxu0  ;;  %v4989_v57 = vld [vmem:[%s6298_s12 + $0x1e8] ss:$16 sps:$4 sm:$0xff]  }
0x1122   : > { %v2980_v1 = vpop.f32.mrb[68].mxu1 }
0x1123   : > { %2995 = vrot.lane.b32.xlu0 %v2980_v1, %s5152_s25  ;;  %v4690_v2 = vpop.f32.mrb[69].mxu1  ;;  %s576_s25 = scalar_lea.vmem [#allocation2], %s575_s19 }
0x1124   : > { %v2983_v4 = vpop.f32.mrb[70].mxu1  ;;  %v4157_v2 = vld [vmem:[%s6297_s11 + $0x1] ss:$0 sm:$0xff]  ;;  %s3881_s24 = sshll.u32 %s576_s25, 4  ;;  %s6246_s24 = int_to_ptr.vmem [resolvable:$true] %s3881_s24 }
0x1125   : > { %v4691_v49 = vpop.f32.mrb[71].mxu1  ;;  %s5082_s1 = scalar_lea.vmem %s6246_s24, 16  ;;  %p5089_p0 = scmp.lt.s32.totalorder %s6246_s24, %s5087_s27 }
0x1126   : > { %p5083_p11 = scmp.ne.s32.totalorder %s6246_s24, %s5082_s1  ;;  %p5090_p1 = scmp.lt.s32.totalorder %s5088_s3, %s5082_s1 }
0x1128   : > { %p5084_p12 = pnand %p5083_p11, %p5288_p5  ;;  %p5091_p2 = por %p5090_p1, %p5089_p0 }
0x112a   : > { %p5085_p13 = pneg %p5084_p12 }
0x112c   : > { %p5092_p3 = pnand %p5091_p2, %p5085_p13 }
0x1161   : > { %v2988_v5 = vpop.permute.xlu0 %2987 }
0x1162   : > { %v2998_v7 = vsel %vm1001_vm2, %v2842_v44, %v2988_v5  ;;  %v4973_v44 = vld [vmem:[%s6298_s12 + $0x18c] ss:$16 sps:$4 sm:$0xff]  }
0x1168   : > { %v2992_v6 = vpop.permute.xlu1 %2991 }
0x1169   : > { %v2999_v8 = vsel %vm1433_vm5, %v2998_v7, %v2992_v6  ;;  %v4992_v6 = vld [vmem:[%s6300_s14 + $0x140] sm:$0xff]  }
0x116a   : > { %v4993_v7 = vld [vmem:[%s6300_s14 + $0x1c0] sm:$0xff]  }
0x1195   : > { %v2996_v10 = vpop.permute.xlu0 %2995 }
0x1196   : > { %v3000_v14 = vsel %vm1435_vm6, %v2999_v8, %v2996_v10  ;;  %v4994_v8 = vld [vmem:[%s6300_s14 + $0x100] sm:$0xff]  }
0x1197   : > { %v3020_v13 = vpack.c.bf16 %v3000_v14, %v3000_v14  ;;  %v4995_v10 = vld [vmem:[%s6300_s14 + $0x180] sm:$0xff]   ;;  %v4996_v14 = vld [vmem:[%s6300_s14 + $0x148] sm:$0xff]  }
0x1199   : > { %4709 = vmatmul.mubr.bf16.vlgmr.msra.gmra.mrb[32].mxu0 %v3020_v13  ;;  %v4997_v13 = vld [vmem:[%s6300_s14 + $0x1c8] sm:$0xff]  }
0x119a   : > { %3435 = vmatprep.mubr.bf16.mxu0 %v5146_v3  ;;  %v4946_v3 = vld [vmem:[%s6298_s12 + $0x104] ss:$16 sps:$4 sm:$0xff]   ;;  %3404 = vmatpush1.bf16.msra.mxu0 %v4947_v27  ;;  %v5007_v27 = vld [vmem:[%s6300_s14 + $0x198] sm:$0xff]  }
0x119b   : > { %3362 = vmatprep.subr.bf16.mxu1 %v4946_v3  ;;  %3405 = vmatprep.subr.bf16.mxu0 %v4955_v26  ;;  %v5006_v3 = vld [vmem:[%s6300_s14 + $0x118] sm:$0xff]   ;;  %v5010_v26 = vld [vmem:[%s6300_s14 + $0x120] sm:$0xff]  }
0x119c   : > { %3363 = vmatpush1.bf16.msra.mxu1 %v4944_v24  ;;  %v5005_v24 = vld [vmem:[%s6300_s14 + $0x1d8] sm:$0xff]  }
0x119e   : > { %3406 = vmatpush1.bf16.msra.mxu0 %v4953_v29  ;;  %v5012_v29 = vld [vmem:[%s6300_s14 + $0x168] sm:$0xff]  }
0x119f   : > { %3407 = vmatprep.subr.bf16.mxu0 %v4961_v31  ;;  %v5014_v31 = vld [vmem:[%s6300_s14 + $0x128] sm:$0xff]  }
0x11a2   : > { %3408 = vmatpush1.bf16.msra.mxu0 %v4959_v33  ;;  %v5016_v33 = vld [vmem:[%s6300_s14 + $0x170] sm:$0xff]  }
0x11a3   : > { %3409 = vmatprep.subr.bf16.mxu0 %v4967_v39  ;;  %v5022_v39 = vld [vmem:[%s6300_s14 + $0x138] sm:$0xff]  }
0x11a6   : > { %3410 = vmatpush1.bf16.msra.mxu0 %v4965_v41  ;;  %v4190_v41 = vld [vmem:[%s6299_s13 + $0x4] sm:$0xf] }
0x11a7   : > { %3411 = vmatprep.subr.bf16.mxu0 %v4973_v44  ;;  %v3193_v44 = vrot.slane %v4190_v41, %v5488_v35 }
0x11aa   : > { %3412 = vmatpush1.bf16.msra.mxu0 %v4971_v9  ;;  %v3197_v9 = vrot.slane %v4190_v41, %v1626_v63 }
0x11ab   : > { %3413 = vmatprep.subr.bf16.mxu0 %v4979_v47 }
0x11ae   : > { %3414 = vmatpush1.bf16.msra.mxu0 %v4977_v50 }
0x11af   : > { %3415 = vmatprep.subr.bf16.mxu0 %v4985_v53 }
0x11b2   : > { %3416 = vmatpush1.bf16.msra.mxu0 %v4983_v52 }
0x11b3   : > { %3417 = vmatprep.subr.bf16.mxu0 %v4991_v55 }
0x11b6   : > { %3418 = vmatpush1.bf16.msra.mxu0 %v4989_v57 }
0x11b7   : > { %4479 = vmatprep.subr.bf16.mxu0 %v4993_v7 }
0x126c   : > { %v3109_v18 = vpop.f32.mrb[32].mxu0 }
0x126d   : > { %v3110_v19 = vadd.f32 %v4145_v16, %v3109_v18  ;;  %v4710_v20 = vpop.f32.mrb[33].mxu0  ;;  %v4998_v16 = vld [vmem:[%s6300_s14 + $0x108] sm:$0xff]  }
0x126e   : > { %v3112_v21 = vpop.f32.mrb[34].mxu0  ;;  %v4999_v18 = vld [vmem:[%s6300_s14 + $0x188] sm:$0xff]   ;;  %v5001_v20 = vld [vmem:[%s6300_s14 + $0x1d0] sm:$0xff]  }
0x126f   : > { %v4711_v22 = vpop.f32.mrb[35].mxu0  ;;  %v3115_v23 = vadd.f32 %v3110_v19, %v5898_v58  ;;  %v4952_v58 = vld [vmem:[%s6298_s12 + $0x124] ss:$16 sps:$4 sm:$0xff]  }
0x1270   : > { %3364 = vmatprep.subr.bf16.mxu1 %v4952_v58  ;;  %v5000_v19 = vld [vmem:[%s6300_s14 + $0x150] sm:$0xff]   ;;  %v5009_v58 = vld [vmem:[%s6300_s14 + $0x1e0] sm:$0xff]  }
0x1271   : > { %3120 = vadd.xlane.f32.xlu1 %v3115_v23  ;;  %3365 = vmatpush1.bf16.msra.mxu1 %v4950_v28  ;;  %v5002_v21 = vld [vmem:[%s6300_s14 + $0x110] sm:$0xff]   ;;  %v5011_v28 = vld [vmem:[%s6300_s14 + $0x1a0] sm:$0xff]  }
0x1272   : > { %3366 = vmatprep.subr.bf16.mxu1 %v4958_v30  ;;  %v5003_v22 = vld [vmem:[%s6300_s14 + $0x190] sm:$0xff]   ;;  %v5013_v30 = vld [vmem:[%s6300_s14 + $0x1e8] sm:$0xff]  }
0x1275   : > { %3367 = vmatpush1.bf16.msra.mxu1 %v4956_v32  ;;  %v5015_v32 = vld [vmem:[%s6300_s14 + $0x1a8] sm:$0xff]  }
0x1276   : > { %3368 = vmatprep.subr.bf16.mxu1 %v4964_v38  ;;  %v5021_v38 = vld [vmem:[%s6300_s14 + $0x1f8] sm:$0xff]  }
0x1279   : > { %3369 = vmatpush1.bf16.msra.mxu1 %v4962_v40  ;;  %v5023_v40 = vld [vmem:[%s6300_s14 + $0x1b8] sm:$0xff]  }
0x127a   : > { %3370 = vmatprep.subr.bf16.mxu1 %v4970_v43  ;;  %v3185_v43 = vrot.slane %v4190_v41, %v5464_v12 }
0x127d   : > { %3371 = vmatpush1.bf16.msra.mxu1 %v4968_v45  ;;  %v3189_v45 = vrot.slane %v4190_v41, %v5470_v15 }
0x127e   : > { %3372 = vmatprep.subr.bf16.mxu1 %v4976_v46 }
0x1281   : > { %3373 = vmatpush1.bf16.msra.mxu1 %v4974_v48 }
0x1282   : > { %3374 = vmatprep.subr.bf16.mxu1 %v4982_v42 }
0x1285   : > { %3375 = vmatpush1.bf16.msra.mxu1 %v4980_v51 }
0x1286   : > { %3376 = vmatprep.subr.bf16.mxu1 %v4988_v54 }
0x1289   : > { %3377 = vmatpush1.bf16.msra.mxu1 %v4986_v56 }
0x128a   : > { %4457 = vmatprep.subr.bf16.mxu1 %v4992_v6 }
0x12fe   : > { %v3121_v17 = vpop.xlane.xlu1 %3120 }
0x12ff   : > { %v3122_v34 = vmul.f32 0.0078125, %v3121_v17  ;;  %v5017_v17 = vld [vmem:[%s6300_s14 + $0x1f0] sm:$0xff]  }
0x1301   : > { %v3123_v36 = vsub.f32 %v3115_v23, %v3122_v34  ;;  %v5004_v23 = vld [vmem:[%s6300_s14 + $0x158] sm:$0xff]   ;;  %v5018_v34 = vld [vmem:[%s6300_s14 + $0x130] sm:$0xff]  }
0x1303   : > { %v3124_v37 = vmul.f32 %v3123_v36, %v3123_v36 }
0x1305   : > { %3125 = vadd.xlane.f32.xlu0 %v3124_v37  ;;  %v5020_v37 = vld [vmem:[%s6300_s14 + $0x178] sm:$0xff]  }
0x1392   : > { %v3126_v59 = vpop.xlane.xlu0 %3125 }
0x1393   : > { %v3127_v60 = vmul.f32 0.0078125, %v3126_v59 }
0x1395   : > { %v3128_v61 = vadd.f32 1e-12, %v3127_v60 }
0x1397   : > { %5070 = vrsqrt.f32 %v3128_v61 }
0x13a1   : > { %v5071_v62 = vpop.eup %5070 }
0x13a2   : > { %v3130_v1 = vmul.f32 %v5071_v62, %v3123_v36  ;;  %v5019_v36 = vld [vmem:[%s6300_s14 + $0x1b0] sm:$0xff]  }
0x13a4   : > { %v3137_v4 = vmul.f32 %v4156_v0, %v3130_v1 }
0x13a6   : > { %v6121_v49 = vadd.f32 %v4157_v2, %v3137_v4 }
0x13a8   : > { %v3180_v5 = vpack.c.bf16 %v6121_v49, %v6121_v49 }
0x13aa   : > { %3395 = vmatmul.mubr.bf16.vlgmr.msra.gmra.mrb[72].mxu1 %v3180_v5  ;;  %3436 = vmatmul.mubr.bf16.vlgmr.msra.gmra.mrb[36].mxu0 %v3180_v5 }
0x13ab   : > { %4458 = vmatpush3.bf16.msra.mxu1 %v4994_v8  ;;  %4480 = vmatpush3.bf16.msra.mxu0 %v4995_v10 }
0x13ac   : > { %4459 = vmatprep.subr.bf16.mxu1 %v4996_v14  ;;  %4481 = vmatprep.subr.bf16.mxu0 %v4997_v13 }
0x13af   : > { %4460 = vmatpush3.bf16.msra.mxu1 %v4998_v16  ;;  %4482 = vmatpush3.bf16.msra.mxu0 %v4999_v18 }
0x13b0   : > { %4461 = vmatprep.subr.bf16.mxu1 %v5000_v19  ;;  %4483 = vmatprep.subr.bf16.mxu0 %v5001_v20 }
0x13b3   : > { %4462 = vmatpush3.bf16.msra.mxu1 %v5002_v21  ;;  %4484 = vmatpush3.bf16.msra.mxu0 %v5003_v22 }
0x13b4   : > { %4463 = vmatprep.subr.bf16.mxu1 %v5004_v23  ;;  %4485 = vmatprep.subr.bf16.mxu0 %v5005_v24 }
0x13b7   : > { %4464 = vmatpush3.bf16.msra.mxu1 %v5006_v3  ;;  %4486 = vmatpush3.bf16.msra.mxu0 %v5007_v27 }
0x13b8   : > { %4465 = vmatprep.subr.bf16.mxu1 %v5008_v25  ;;  %4487 = vmatprep.subr.bf16.mxu0 %v5009_v58 }
0x13bb   : > { %4466 = vmatpush3.bf16.msra.mxu1 %v5010_v26  ;;  %4488 = vmatpush3.bf16.msra.mxu0 %v5011_v28 }
0x13bc   : > { %4467 = vmatprep.subr.bf16.mxu1 %v5012_v29  ;;  %4489 = vmatprep.subr.bf16.mxu0 %v5013_v30 }
0x13bf   : > { %4468 = vmatpush3.bf16.msra.mxu1 %v5014_v31  ;;  %4490 = vmatpush3.bf16.msra.mxu0 %v5015_v32 }
0x13c0   : > { %4469 = vmatprep.subr.bf16.mxu1 %v5016_v33  ;;  %4491 = vmatprep.subr.bf16.mxu0 %v5017_v17 }
0x13c3   : > { %4470 = vmatpush3.bf16.msra.mxu1 %v5018_v34  ;;  %4492 = vmatpush3.bf16.msra.mxu0 %v5019_v36 }
0x13c4   : > { %4471 = vmatprep.subr.bf16.mxu1 %v5020_v37  ;;  %4493 = vmatprep.subr.bf16.mxu0 %v5021_v38  ;;  %v4288_v37 = vld [vmem:[%s6301_s15 + $0x1] ss:$0 sm:$0xff] }
0x13c7   : > { %4472 = vmatpush3.bf16.msra.mxu1 %v5022_v39  ;;  %4494 = vmatpush3.bf16.msra.mxu0 %v5023_v40 }
0x147d   : > { %v3396_v46 = vpop.f32.mrb[72].mxu1  ;;  %v3437_v47 = vpop.f32.mrb[36].mxu0 }
0x147e   : > { %v3397_v48 = vadd.f32 %v3396_v46, %v3185_v43  ;;  %v3438_v50 = vadd.f32 %v3437_v47, %v3193_v44  ;;  %v3398_v51 = vpop.f32.mrb[73].mxu1  ;;  %v3439_v42 = vpop.f32.mrb[37].mxu0 }
0x147f   : > { %v3399_v52 = vadd.f32 %v3398_v51, %v3189_v45  ;;  %v3440_v53 = vadd.f32 %v3439_v42, %v3197_v9  ;;  %v3400_v54 = vpop.f32.mrb[74].mxu1  ;;  %v3441_v55 = vpop.f32.mrb[38].mxu0 }
0x1480   : > { %v3448_v56 = vmul.f32 0.044715, %v3397_v48  ;;  %v3450_v57 = vmul.f32 0.044715, %v3438_v50  ;;  %v3401_v12 = vpop.f32.mrb[75].mxu1  ;;  %v3442_v59 = vpop.f32.mrb[39].mxu0 }
0x1481   : > { %v3449_v35 = vmul.f32 0.044715, %v3399_v52  ;;  %v3451_v60 = vmul.f32 0.044715, %v3440_v53  ;;  %v3444_v19 = vmul.f32 0.5, %v3397_v48  ;;  %v3445_v22 = vmul.f32 0.5, %v3399_v52 }
0x1482   : > { %v3452_v15 = vmul.f32 %v3448_v56, %v3397_v48  ;;  %v3454_v61 = vmul.f32 %v3450_v57, %v3438_v50  ;;  %v3447_v3 = vmul.f32 0.5, %v3440_v53  ;;  %v3446_v26 = vmul.f32 0.5, %v3438_v50  ;;  %v4323_v57 = vld [vmem:[%s6302_s16 + $0x1] ss:$0 sm:$0xff] }
0x1483   : > { %v3453_v11 = vmul.f32 %v3449_v35, %v3399_v52  ;;  %v3455_v63 = vmul.f32 %v3451_v60, %v3440_v53 }
0x1484   : > { %v3456_v62 = vmul.f32 %v3452_v15, %v3397_v48  ;;  %v3458_v0 = vmul.f32 %v3454_v61, %v3438_v50 }
0x1485   : > { %v3457_v1 = vmul.f32 %v3453_v11, %v3399_v52  ;;  %v3459_v2 = vmul.f32 %v3455_v63, %v3440_v53 }
0x1486   : > { %v3460_v4 = vadd.f32 %v3456_v62, %v3397_v48  ;;  %v3462_v5 = vadd.f32 %v3458_v0, %v3438_v50 }
0x1487   : > { %v3461_v6 = vadd.f32 %v3457_v1, %v3399_v52  ;;  %v3463_v7 = vadd.f32 %v3459_v2, %v3440_v53 }
0x1488   : > { %v3464_v8 = vmul.f32 0.7978846, %v3460_v4  ;;  %v3466_v13 = vmul.f32 0.7978846, %v3462_v5 }
0x1489   : > { %v3465_v10 = vmul.f32 0.7978846, %v3461_v6  ;;  %v3467_v14 = vmul.f32 0.7978846, %v3463_v7 }
0x148a   : > { %5072 = vtanh.f32 %v3464_v8 }
0x148b   : > { %5074 = vtanh.f32 %v3465_v10 }
0x148c   : > { %5076 = vtanh.f32 %v3467_v14 }
0x148d   : > { %5078 = vtanh.f32 %v3466_v13 }
0x1494   : > { %v5073_v16 = vpop.eup %5072 }
0x1495   : > { %v5075_v18 = vpop.eup %5074  ;;  %v3472_v20 = vadd.f32 1.0, %v5073_v16 }
0x1496   : > { %v5077_v21 = vpop.eup %5076  ;;  %v3473_v23 = vadd.f32 1.0, %v5075_v18 }
0x1497   : > { %v5079_v24 = vpop.eup %5078  ;;  %v3475_v27 = vadd.f32 1.0, %v5077_v21  ;;  %v3476_v25 = vmul.f32 %v3472_v20, %v3444_v19 }
0x1498   : > { %v3477_v58 = vmul.f32 %v3473_v23, %v3445_v22  ;;  %v3474_v28 = vadd.f32 1.0, %v5079_v24 }
0x1499   : > { %v3479_v29 = vmul.f32 %v3475_v27, %v3447_v3  ;;  %v3547_v33 = vpack.c.bf16 %v3476_v25, %v3476_v25 }
0x149a   : > { %v3548_v30 = vpack.c.bf16 %v3477_v58, %v3477_v58  ;;  %v3478_v31 = vmul.f32 %v3474_v28, %v3446_v26 }
0x149b   : > { %v3550_v32 = vpack.c.bf16 %v3479_v29, %v3479_v29 }
0x149c   : > { %3781 = vmatprep.mubr.bf16.mxu1 %v3548_v30  ;;  %v3549_v17 = vpack.c.bf16 %v3478_v31, %v3478_v31 }
0x149d   : > { %3821 = vmatprep.mubr.bf16.mxu0 %v3550_v32  ;;  %3782 = vmatmul.mubr.bf16.vlgmr.msra.gmra.mrb[76].mxu1 %v3547_v33 }
0x149e   : > { %3822 = vmatmul.mubr.bf16.vlgmr.msra.gmra.mrb[40].mxu0 %v3549_v17 }
0x1570   : > { %v4473_v34 = vpop.f32.mrb[76].mxu1 }
0x1571   : > { %v4495_v36 = vpop.f32.mrb[40].mxu0  ;;  %v4474_v38 = vpop.f32.mrb[77].mxu1 }
0x1572   : > { %v4475_v39 = vadd.f32 %v4474_v38, %v4473_v34  ;;  %v4496_v40 = vpop.f32.mrb[41].mxu0  ;;  %v4476_v41 = vpop.f32.mrb[78].mxu1 }
0x1573   : > { %v4497_v43 = vadd.f32 %v4496_v40, %v4495_v36  ;;  %v4498_v44 = vpop.f32.mrb[42].mxu0  ;;  %v4477_v45 = vpop.f32.mrb[79].mxu1 }
0x1574   : > { %v3784_v9 = vadd.f32 %v4475_v39, %v4288_v37  ;;  %v4499_v46 = vpop.f32.mrb[43].mxu0 }
0x1576   : > { %v3824_v47 = vadd.f32 %v4497_v43, %v3784_v9 }
0x1578   : > { %v3829_v48 = vadd.f32 %v3824_v47, %v6121_v49  ;;  %v4324_v49 = vld [vmem:[%s6303_s17 + $0x1] ss:$0 sm:$0xff] }
0x157a   : > { %3834 = vadd.xlane.f32.xlu0 %v3829_v48 }
0x1607   : > { %v3835_v50 = vpop.xlane.xlu0 %3834 }
0x1608   : > { %v3836_v51 = vmul.f32 0.0078125, %v3835_v50 }
0x160a   : > { %v3837_v42 = vsub.f32 %v3829_v48, %v3836_v51 }
0x160c   : > { %v3838_v52 = vmul.f32 %v3837_v42, %v3837_v42 }
0x160e   : > { %3839 = vadd.xlane.f32.xlu1 %v3838_v52 }
0x169b   : > { %v3840_v53 = vpop.xlane.xlu1 %3839 }
0x169c   : > { %v3841_v54 = vmul.f32 0.0078125, %v3840_v53 }
0x169e   : > { %v3842_v55 = vadd.f32 1e-12, %v3841_v54 }
0x16a0   : > { %5080 = vrsqrt.f32 %v3842_v55 }
0x16aa   : > { %v5081_v56 = vpop.eup %5080 }
0x16ab   : > { %v3844_v12 = vmul.f32 %v5081_v56, %v3837_v42 }
0x16ad   : > { %v3851_v59 = vmul.f32 %v4323_v57, %v3844_v12 }
0x16af   : > { %v3858_v35 = vadd.f32 %v4324_v49, %v3851_v59 }
0x16b1   : > { %v3859_v60 = vrot.slane %v3858_v35, 4 }
0x16b3   : > { %v3860_v15 = vadd.f32 %v3859_v60, %v3858_v35 }
0x16b5   : > { %v3861_v61 = vrot.slane %v3860_v15, 2 }
0x16b7   : > { %v3862_v11 = vadd.f32 %v3861_v61, %v3860_v15 }
0x16b9   : > { %v3863_v63 = vrot.slane %v3862_v11, 1 }
0x16bb   : > { %v3864_v62 = vadd.f32 %v3863_v63, %v3862_v11 }
0x16bd   : > { %v3866_v0 = vmul.f32 0.125, %v3864_v62 }
0x16bf   : > { %3867 = vst [vmem:[%s576_s25] sm:$0x1] %v3866_v0 }
0x16c0   : > { %5095 = shalt.err (!%p5092_p3)
}
0x16c1   : > { %s5096_s19 = scalar_lea.hbm %s6244_s23, 16  ;;  %s5100_s20 = scalar_lea.hbm %s6341_s22, 32 }
0x16c2   : > { %p5097_p4 = scmp.ne.s32.totalorder %s6244_s23, %s5096_s19  ;;  %p5101_p9 = scmp.lt.u32.totalorder %s6244_s23, %s6341_s22 }
0x16c3   : > { %p5102_p10 = scmp.lt.u32.totalorder %s5100_s20, %s5096_s19  ;;  %p5104_p12 = scmp.lt.u32.totalorder %s5096_s19, %s6244_s23 }
0x16c4   : > { %p5098_p7 = pnand %p5097_p4, %p5288_p5 }
0x16c5   : > { %p5103_p11 = por %p5102_p10, %p5101_p9 }
0x16c6   : > { %p5099_p8 = pneg %p5098_p7 }
0x16c7   : > { %p5105_p13 = por %p5104_p12, %p5103_p11 }
0x16c9   : > { %p5106_p0 = pnand %p5105_p13, %p5099_p8 }
0x16cb   : > { %5109 = shalt.err (!%p5106_p0)
}
0x16cc   : > { %4736 = dma.vmem_to_hbm [thread:$0]  (%p5288_p5), %s6246_s24, 16, %s6244_s23, %s3869_s18  }
0x16cd PF: > { %s6342_s3 = sld [smem:[#allocation7_spill]]  ;;  %s6343_s1 = sld [smem:[#allocation5_spill]] }
0x16d3   : > { %p4742_p1 = scmp.ge.s32.totalorder %s6342_s3, 2  ;;  %s3893_s27 = sand.u32 1, %s6343_s1  }
0x16d4   : > { %s3894_s2 = scalar_lea.sflag [#allocation3], %s3893_s27 }
0x16d5   : > { %p4739_p2 = pnand %p4742_p1, %p5292_p6 }
0x16d7   : > { %5127 = dma.done.wait (!%p4739_p2), %s3894_s2, 16  }
0x16d8   : > { %5129 = vsyncadd (!%p4739_p2), %s3894_s2, 4294967280  ;;  %s6345_s30 = sld [smem:[#allocation8_spill]]  ;;  %s6346_s19 = sld [smem:[#allocation6_spill]] }
0x16d9   : > { %s6347_s29 = sld [smem:[#allocation9_spill]]  ;;  %s6348_s27 = smov %s5136_s28 }
0x16de   : > { %p28_p3 = scmp.ge.s32.totalorder %s6345_s30, 4   ;;  %s6349_s28 = smov %s6346_s19 }
0x16e0   :  { %30 = sbr.rel (!%p28_p3) target bundleno = 9 (0x9), region = 142 }
0x16e7   :  { %3898 = vsyncpa [#allocation3], 1 }
0x16e8   :  { %3900 = vsyncpa [#allocation3 + $0x1], 1 }

</bundles_post_ra>
